<compile_context>
chip_gen: v7x
topology: tpu7x:2x2x1
jax: 0.10.0
libtpu: 0.0.40
codegen_flags: <defaults>
</compile_context>

<pallas_src>
import jax
import jax.numpy as jnp
from jax import lax
from jax.experimental import pallas as pl
from jax.experimental.pallas import tpu as pltpu


def _occ_mlp_kernel(x_ref,
                    w1_ref, b1_ref,
                    w2_ref, b2_ref,
                    w3_ref, b3_ref,
                    w4_ref, b4_ref,
                    o_ref):
    cdt = w1_ref.dtype                      # MXU operand dtype (bf16 or f32)

    # Layer 1: x arrives batch-major (block_n, d_in); contracting the last
    # dim of both operands yields a feature-major (64, block_n) activation
    # directly (W1 @ x^T) without a host- or explicit on-chip transpose.
    x = x_ref[...].astype(cdt)
    h = lax.dot_general(w1_ref[...], x,
                        dimension_numbers=(((1,), (1,)), ((), ())),
                        preferred_element_type=jnp.float32)
    h = jnp.maximum(h + b1_ref[...], 0.0)

    # Hidden layers 2 & 3: MXU matmuls with f32 accumulation; bias-add + ReLU
    # run in f32 on the VPU; only the MXU operands are (optionally) bf16.
    h = jnp.dot(w2_ref[...], h.astype(cdt), preferred_element_type=jnp.float32)
    h = jnp.maximum(h + b2_ref[...], 0.0)

    h = jnp.dot(w3_ref[...], h.astype(cdt), preferred_element_type=jnp.float32)
    h = jnp.maximum(h + b3_ref[...], 0.0)

    # Final 1x64 layer off the MXU: broadcast-mul (VPU) + sublane-reduce (XLU).
    out = jnp.sum(w4_ref[...] * h, axis=0, keepdims=True) + b4_ref[...]
    o_ref[...] = out.astype(o_ref.dtype)


def simple_occ_net(x, params, *, block_n=1024, compute_dtype=jnp.bfloat16):
    """x: (N, input_dim).  params: list of 4 (W, b) with W: (out, in), b: (out,)
    (PyTorch nn.Linear layout).  compute_dtype: MXU operand dtype (default
    bf16 on all generations); accumulation / epilogue stay f32.
    Returns (N, output_dim) float32."""
    N, d_in = x.shape
    assert len(params) == 4, "kernel is specialized to 3 hidden layers + output"
    (w1, b1), (w2, b2), (w3, b3), (w4, b4) = params
    d_out = w4.shape[0]
    assert d_out == 1

    cdt = jnp.dtype(compute_dtype if compute_dtype is not None else x.dtype)

    # Batch tile (lane axis): multiple of 128, no wider than the padded batch.
    block_n = max(128, (int(block_n) // 128) * 128)
    block_n = min(block_n, max(128, pl.cdiv(N, 128) * 128))
    n_pad = pl.cdiv(N, block_n) * block_n

    x_in = x
    if n_pad != N:
        # Tail-block padding only (no transpose pass; demo sizes avoid this).
        x_in = jnp.pad(x, ((0, n_pad - N), (0, 0)))

    # Weights as (out, in) in the MXU dtype; biases as (out, 1) f32 columns.
    w1c, w2c, w3c = (w.astype(cdt) for w in (w1, w2, w3))
    b1c, b2c, b3c = (b.reshape(-1, 1).astype(jnp.float32) for b in (b1, b2, b3))
    w4c = w4.reshape(-1, 1).astype(jnp.float32)     # (64, 1) -> stays on VPU/XLU
    b4c = b4.reshape(1, 1).astype(jnp.float32)

    def full_spec(arr):
        return pl.BlockSpec(arr.shape, lambda i: (0, 0))

    flops = int(2 * n_pad * (d_in * w1.shape[0]
                             + w2.shape[1] * w2.shape[0]
                             + w3.shape[1] * w3.shape[0]
                             + w4.shape[1] * d_out))
    bytes_accessed = int(
        x_in.size * x_in.dtype.itemsize + n_pad * d_out * 4
        + sum(a.size * a.dtype.itemsize
              for a in (w1c, b1c, w2c, b2c, w3c, b3c, w4c, b4c)))

    grid = (n_pad // block_n,)
    out = pl.pallas_call(
        _occ_mlp_kernel,
        out_shape=jax.ShapeDtypeStruct((d_out, n_pad), jnp.float32),
        grid_spec=pltpu.PrefetchScalarGridSpec(
            num_scalar_prefetch=0,
            grid=grid,
            in_specs=[
                pl.BlockSpec((block_n, d_in), lambda i: (i, 0)),
                full_spec(w1c), full_spec(b1c),
                full_spec(w2c), full_spec(b2c),
                full_spec(w3c), full_spec(b3c),
                full_spec(w4c), full_spec(b4c),
            ],
            out_specs=pl.BlockSpec((d_out, block_n), lambda i: (0, i)),
        ),
        compiler_params=pltpu.CompilerParams(
            dimension_semantics=("parallel",)),
        cost_estimate=pl.CostEstimate(
            flops=flops, transcendentals=0, bytes_accessed=bytes_accessed),
    )(x_in, w1c, b1c, w2c, b2c, w3c, b3c, w4c, b4c)

    return out[:, :N].T      # (1, N) -> (N, 1); transpose of a (1, N) is free


def init_params(key, dims):
    """nn.Linear-style params: weight (out, in), bias (out,), U(-1/sqrt(in), 1/sqrt(in))."""
    params = []
    for i in range(len(dims) - 1):
        d_in, d_out = dims[i], dims[i + 1]
        key, kw, kb = jax.random.split(key, 3)
        bound = 1.0 / jnp.sqrt(d_in)
        w = jax.random.uniform(kw, (d_out, d_in), jnp.float32, -bound, bound)
        b = jax.random.uniform(kb, (d_out,), jnp.float32, -bound, bound)
        params.append((w, b))
    return params


def reference_forward(x, params):
    h = x
    n = len(params)
    for i, (w, b) in enumerate(params):
        h = h @ w.T + b
        if i < n - 1:
            h = jnp.maximum(h, 0.0)
    return h


if __name__ == "__main__":
    cfg_input_dim = 18
    cfg_hidden = [64, 64, 64]
    cfg_output_dim = 1
    dims = [cfg_input_dim] + cfg_hidden + [cfg_output_dim]

    key = jax.random.PRNGKey(0)
    key, kx = jax.random.split(key)
    N = 4096  # grid=(4,) at block_n=1024: even step count, 2 steps per v7x TC
    x = jax.random.normal(kx, (N, cfg_input_dim), jnp.float32)

    params = init_params(key, dims)
    ref = reference_forward(x, params)

    # Default path: bf16 MXU operands, f32 accumulation / epilogue.
    out_bf16 = jax.block_until_ready(simple_occ_net(x, params))
    assert out_bf16.shape == (N, cfg_output_dim)
    assert jnp.allclose(out_bf16, ref, atol=5e-2, rtol=5e-2), "bf16 mismatch vs JAX reference"

    # Full-f32 path: tight check of the fused dataflow itself.
    out_f32 = jax.block_until_ready(
        simple_occ_net(x, params, compute_dtype=jnp.float32))
    assert out_f32.shape == (N, cfg_output_dim)
    assert jnp.allclose(out_f32, ref, atol=1e-4, rtol=1e-4), "f32 mismatch vs JAX reference"

    print("KERNEL_OK")
</pallas_src>

<mosaic_0001>
module attributes {stable_mosaic.version = 11 : i64} {
  func.func @_occ_mlp_kernel(%arg0: i32, %arg1: memref<1024x18xf32, #tpu.memory_space<vmem>>, %arg2: memref<64x18xbf16, #tpu.memory_space<vmem>>, %arg3: memref<64x1xf32, #tpu.memory_space<vmem>>, %arg4: memref<64x64xbf16, #tpu.memory_space<vmem>>, %arg5: memref<64x1xf32, #tpu.memory_space<vmem>>, %arg6: memref<64x64xbf16, #tpu.memory_space<vmem>>, %arg7: memref<64x1xf32, #tpu.memory_space<vmem>>, %arg8: memref<64x1xf32, #tpu.memory_space<vmem>>, %arg9: memref<1x1xf32, #tpu.memory_space<vmem>>, %arg10: memref<1x1024xf32, #tpu.memory_space<vmem>>) attributes {dimension_semantics = [#tpu.dimension_semantics<parallel>], iteration_bounds = array<i64: 4>, scalar_prefetch = 0 : i64, scratch_operands = 0 : i64, tpu.core_type = #tpu.core_type<tc>, window_params = [{transform_indices = @transform_0, window_bounds = array<i64: 1024, 18>}, {pipeline_mode = #tpu.pipeline_mode<synchronous>, transform_indices = @transform_1, window_bounds = array<i64: 64, 18>}, {pipeline_mode = #tpu.pipeline_mode<synchronous>, transform_indices = @transform_2, window_bounds = array<i64: 64, 1>}, {pipeline_mode = #tpu.pipeline_mode<synchronous>, transform_indices = @transform_3, window_bounds = array<i64: 64, 64>}, {pipeline_mode = #tpu.pipeline_mode<synchronous>, transform_indices = @transform_4, window_bounds = array<i64: 64, 1>}, {pipeline_mode = #tpu.pipeline_mode<synchronous>, transform_indices = @transform_5, window_bounds = array<i64: 64, 64>}, {pipeline_mode = #tpu.pipeline_mode<synchronous>, transform_indices = @transform_6, window_bounds = array<i64: 64, 1>}, {pipeline_mode = #tpu.pipeline_mode<synchronous>, transform_indices = @transform_7, window_bounds = array<i64: 64, 1>}, {pipeline_mode = #tpu.pipeline_mode<synchronous>, transform_indices = @transform_8, window_bounds = array<i64: 1, 1>}, {transform_indices = @transform_9, window_bounds = array<i64: 1, 1024>}]} {
    %c0 = arith.constant 0 : index
    %c0_0 = arith.constant 0 : index
    %0 = vector.load %arg1[%c0, %c0_0] : memref<1024x18xf32, #tpu.memory_space<vmem>>, vector<1024x18xf32>
    %1 = arith.truncf %0 : vector<1024x18xf32> to vector<1024x18xbf16>
    %c0_1 = arith.constant 0 : index
    %c0_2 = arith.constant 0 : index
    %2 = vector.load %arg2[%c0_1, %c0_2] : memref<64x18xbf16, #tpu.memory_space<vmem>>, vector<64x18xbf16>
    %cst = arith.constant dense<0.000000e+00> : vector<64x1024xf32>
    %3 = tpu.matmul %2, %1, %cst {dimension_numbers = #tpu.dot_dimension_numbers<[1], [1], [0], [0], [0, 0, 1, 0], [], []>} : vector<64x18xbf16>, vector<1024x18xbf16>, vector<64x1024xf32> -> vector<64x1024xf32>
    %c0_3 = arith.constant 0 : index
    %c0_4 = arith.constant 0 : index
    %4 = vector.load %arg3[%c0_3, %c0_4] : memref<64x1xf32, #tpu.memory_space<vmem>>, vector<64x1xf32>
    %5 = vector.broadcast %4 : vector<64x1xf32> to vector<64x1024xf32>
    %6 = arith.addf %3, %5 : vector<64x1024xf32>
    %cst_5 = arith.constant 0.000000e+00 : f32
    %7 = vector.broadcast %cst_5 : f32 to vector<64x1024xf32>
    %8 = arith.maximumf %6, %7 : vector<64x1024xf32>
    %c0_6 = arith.constant 0 : index
    %c0_7 = arith.constant 0 : index
    %9 = vector.load %arg4[%c0_6, %c0_7] : memref<64x64xbf16, #tpu.memory_space<vmem>>, vector<64x64xbf16>
    %10 = arith.truncf %8 : vector<64x1024xf32> to vector<64x1024xbf16>
    %cst_8 = arith.constant dense<0.000000e+00> : vector<64x1024xf32>
    %11 = tpu.matmul %9, %10, %cst_8 {dimension_numbers = #tpu.dot_dimension_numbers<[1], [0], [0], [1], [0, 0, 1, 1], [], []>} : vector<64x64xbf16>, vector<64x1024xbf16>, vector<64x1024xf32> -> vector<64x1024xf32>
    %c0_9 = arith.constant 0 : index
    %c0_10 = arith.constant 0 : index
    %12 = vector.load %arg5[%c0_9, %c0_10] : memref<64x1xf32, #tpu.memory_space<vmem>>, vector<64x1xf32>
    %13 = vector.broadcast %12 : vector<64x1xf32> to vector<64x1024xf32>
    %14 = arith.addf %11, %13 : vector<64x1024xf32>
    %cst_11 = arith.constant 0.000000e+00 : f32
    %15 = vector.broadcast %cst_11 : f32 to vector<64x1024xf32>
    %16 = arith.maximumf %14, %15 : vector<64x1024xf32>
    %c0_12 = arith.constant 0 : index
    %c0_13 = arith.constant 0 : index
    %17 = vector.load %arg6[%c0_12, %c0_13] : memref<64x64xbf16, #tpu.memory_space<vmem>>, vector<64x64xbf16>
    %18 = arith.truncf %16 : vector<64x1024xf32> to vector<64x1024xbf16>
    %cst_14 = arith.constant dense<0.000000e+00> : vector<64x1024xf32>
    %19 = tpu.matmul %17, %18, %cst_14 {dimension_numbers = #tpu.dot_dimension_numbers<[1], [0], [0], [1], [0, 0, 1, 1], [], []>} : vector<64x64xbf16>, vector<64x1024xbf16>, vector<64x1024xf32> -> vector<64x1024xf32>
    %c0_15 = arith.constant 0 : index
    %c0_16 = arith.constant 0 : index
    %20 = vector.load %arg7[%c0_15, %c0_16] : memref<64x1xf32, #tpu.memory_space<vmem>>, vector<64x1xf32>
    %21 = vector.broadcast %20 : vector<64x1xf32> to vector<64x1024xf32>
    %22 = arith.addf %19, %21 : vector<64x1024xf32>
    %cst_17 = arith.constant 0.000000e+00 : f32
    %23 = vector.broadcast %cst_17 : f32 to vector<64x1024xf32>
    %24 = arith.maximumf %22, %23 : vector<64x1024xf32>
    %c0_18 = arith.constant 0 : index
    %c0_19 = arith.constant 0 : index
    %25 = vector.load %arg8[%c0_18, %c0_19] : memref<64x1xf32, #tpu.memory_space<vmem>>, vector<64x1xf32>
    %26 = vector.broadcast %25 : vector<64x1xf32> to vector<64x1024xf32>
    %27 = arith.mulf %26, %24 : vector<64x1024xf32>
    %cst_20 = arith.constant dense<0.000000e+00> : vector<1024xf32>
    %28 = vector.multi_reduction <add>, %27, %cst_20 [0] : vector<64x1024xf32> to vector<1024xf32>
    %29 = vector.shape_cast %28 : vector<1024xf32> to vector<1x1024xf32>
    %c0_21 = arith.constant 0 : index
    %c0_22 = arith.constant 0 : index
    %30 = vector.load %arg9[%c0_21, %c0_22] : memref<1x1xf32, #tpu.memory_space<vmem>>, vector<1x1xf32>
    %31 = vector.broadcast %30 : vector<1x1xf32> to vector<1x1024xf32>
    %32 = arith.addf %29, %31 : vector<1x1024xf32>
    %c0_23 = arith.constant 0 : index
    %c0_24 = arith.constant 0 : index
    %33 = vector.load %arg10[%c0_23, %c0_24] : memref<1x1024xf32, #tpu.memory_space<vmem>>, vector<1x1024xf32>
    tpu.vector_store %arg10[%c0_23, %c0_24], %32 {strides = array<i32>} : memref<1x1024xf32, #tpu.memory_space<vmem>>, vector<1x1024xf32>,
    return
  }
  func.func @transform_0(%arg0: i32) -> (i32, i32) {
    %c0_i32 = arith.constant 0 : i32
    %c0_i32_0 = arith.constant 0 : i32
    return %arg0, %c0_i32 : i32, i32
  }
  func.func @transform_1(%arg0: i32) -> (i32, i32) {
    %c0_i32 = arith.constant 0 : i32
    %c0_i32_0 = arith.constant 0 : i32
    %c0_i32_1 = arith.constant 0 : i32
    return %c0_i32, %c0_i32_0 : i32, i32
  }
  func.func @transform_2(%arg0: i32) -> (i32, i32) {
    %c0_i32 = arith.constant 0 : i32
    %c0_i32_0 = arith.constant 0 : i32
    %c0_i32_1 = arith.constant 0 : i32
    return %c0_i32, %c0_i32_0 : i32, i32
  }
  func.func @transform_3(%arg0: i32) -> (i32, i32) {
    %c0_i32 = arith.constant 0 : i32
    %c0_i32_0 = arith.constant 0 : i32
    %c0_i32_1 = arith.constant 0 : i32
    return %c0_i32, %c0_i32_0 : i32, i32
  }
  func.func @transform_4(%arg0: i32) -> (i32, i32) {
    %c0_i32 = arith.constant 0 : i32
    %c0_i32_0 = arith.constant 0 : i32
    %c0_i32_1 = arith.constant 0 : i32
    return %c0_i32, %c0_i32_0 : i32, i32
  }
  func.func @transform_5(%arg0: i32) -> (i32, i32) {
    %c0_i32 = arith.constant 0 : i32
    %c0_i32_0 = arith.constant 0 : i32
    %c0_i32_1 = arith.constant 0 : i32
    return %c0_i32, %c0_i32_0 : i32, i32
  }
  func.func @transform_6(%arg0: i32) -> (i32, i32) {
    %c0_i32 = arith.constant 0 : i32
    %c0_i32_0 = arith.constant 0 : i32
    %c0_i32_1 = arith.constant 0 : i32
    return %c0_i32, %c0_i32_0 : i32, i32
  }
  func.func @transform_7(%arg0: i32) -> (i32, i32) {
    %c0_i32 = arith.constant 0 : i32
    %c0_i32_0 = arith.constant 0 : i32
    %c0_i32_1 = arith.constant 0 : i32
    return %c0_i32, %c0_i32_0 : i32, i32
  }
  func.func @transform_8(%arg0: i32) -> (i32, i32) {
    %c0_i32 = arith.constant 0 : i32
    %c0_i32_0 = arith.constant 0 : i32
    %c0_i32_1 = arith.constant 0 : i32
    return %c0_i32, %c0_i32_0 : i32, i32
  }
  func.func @transform_9(%arg0: i32) -> (i32, i32) {
    %c0_i32 = arith.constant 0 : i32
    %c0_i32_0 = arith.constant 0 : i32
    return %c0_i32, %arg0 : i32, i32
  }
}

</mosaic_0001>

<bundles_post_ra>
// kernel: tpu_custom_call.1
= control target key start
LH: loop header
LB: loop body
LE: loop exit
PB: predicated region body
PF: predicated region fallthrough
CT: control target
= control target key end

     0   :  { %s3820_s0 = inlined_call_operand.vmem [shape: f32[4096,18], index: 0, kind: input, shape index: {}]   ;;  %s3821_s1 = inlined_call_operand.vmem [shape: bf16[64,18], index: 1, kind: input, shape index: {}]   ;;  %s3822_s2 = inlined_call_operand.vmem [shape: f32[64,1], index: 2, kind: input, shape index: {}]   ;;  %s3823_s3 = inlined_call_operand.vmem [shape: bf16[64,64], index: 3, kind: input, shape index: {}]   ;;  %s3824_s4 = inlined_call_operand.vmem [shape: f32[64,1], index: 4, kind: input, shape index: {}]   ;;  %s3825_s5 = inlined_call_operand.vmem [shape: bf16[64,64], index: 5, kind: input, shape index: {}]   ;;  %s3826_s6 = inlined_call_operand.vmem [shape: f32[64,1], index: 6, kind: input, shape index: {}]   ;;  %s3827_s7 = inlined_call_operand.vmem [shape: f32[64,1], index: 7, kind: input, shape index: {}]   ;;  %s3828_s8 = inlined_call_operand.<no memory space> [shape: f32[1,1], index: 8, kind: input, shape index: {}]   ;;  %s3829_s9 = inlined_call_operand.hbm [shape: f32[1,4096], index: 9, kind: output, shape index: {}]  }
   0x1   :  { %v14_v0 = vstv %s3828_s8 }
   0x2   :  { %15 = vst [vmem:[#allocation2] sm:$0x1] %v14_v0 }
   0x3   :  { %16 = vsyncpa [#allocation4], 0 }
   0x4   :  { %18 = vsyncpa [#allocation4 + $0x1], 0  ;;  %s2862_s11 = smov 0   ;;  %s2864_s12 = smov 0  }
   0x5   :  { %s2866_s13 = smov 0   ;;  %s2868_s14 = smov 0  }
   0x6 LB: > { %s2485_s8 = sadd.s32 4294967295, %s2804_s14   ;;  %s2486_s15 = sadd.s32 4294967294, %s2804_s14   ;;  %s2804_s14 = sphi %s2868_s14, %s3835_s14   ;;  %s2800_s13 = sphi %s2866_s13, %s3834_s13   ;;  %s2796_s12 = sphi %s2864_s12, %s3833_s12   ;;  %s2792_s11 = sphi %s2862_s11, %s3832_s11  }
   0x7   : > { %s2885_s16 = sadd.s32 1, %s2804_s14   ;;  %s225_s17 = sadd.s32 1, %s2800_s13 }
   0x8   : > { %s222_s18 = ssub.s32 %s2804_s14, %s2885_s16  ;;  %p235_p0 = scmp.ne.s32.totalorder %s2800_s13, %s2796_s12 }
   0x9   : > { %p223_p1 = scmp.eq.s32.totalorder %s222_s18, 0  ;;  %p236_p2 = scmp.eq.s32.totalorder %s2485_s8, 3 }
   0xa   : > { %p241_p3 = scmp.ne.s32.totalorder %s2796_s12, %s2792_s11  ;;  %p242_p4 = scmp.eq.s32.totalorder %s2486_s15, 3 }
   0xb   : > { %s2895_s19 = scalar_select %p223_p1, %s2800_s13, %s225_s17  }
   0xc   : > { %p2897_p5 = por %p236_p2, %p235_p0  ;;  %p2901_p6 = por %p242_p4, %p241_p3 }
   0xd   : > { %p2489_p7 = scmp.ge.s32.totalorder %s2804_s14, 1  ;;  %p293_p8 = scmp.lt.s32.totalorder %s2804_s14, 5 }
   0xf   : > { %p294_p9 = pnand %p2489_p7, %p293_p8 }
  0x10   : > { %s2907_s22 = sshll.u32 (!%p294_p9), %s2485_s8, 7  ;;  %v2913_v1 = vld [vmem:[%s3821_s1] sm:$0xff] (!%p294_p9)   ;;  %vm605_vm0 = vcmask (!%p294_p9), 146432   ;;  %v2806_v2 = vmov (!%p294_p9), 0   ;;  %v538_v4 = vld [vmem:[%s3822_s2 + $0x8] sm:$0xff] (!%p294_p9)  ;;  %v539_v5 = vld [vmem:[%s3822_s2 + $0x10] sm:$0xff] (!%p294_p9) }
  0x11   : > { %297 = sbr.rel (%p294_p9) target bundleno = 945 (0x3b1), region = 56  ;;  %p330_p10 = scmp.lt.s32.totalorder (!%p294_p9), %s2907_s22, 511  ;;  %2575 = vmatprep.mubr.msk.bf16.mxu0 (!%p294_p9), %vm605_vm0, %v2913_v1  ;;  %2599 = vmatprep.mubr.msk.bf16.mxu1 (!%p294_p9), %vm605_vm0, %v2913_v1  ;;  %v537_v3 = vld [vmem:[%s3822_s2] sm:$0xff] (!%p294_p9)  ;;  %v543_v37 = vld [vmem:[%s3822_s2 + $0x30] sm:$0xff] (!%p294_p9)  ;;  %vm1274_vm1 = vcmask (!%p294_p9), 523264  }
  0x12   : > { %2728 = vset.pattern.permute.xlu0 (!%p294_p9), %v2806_v2  ;;  %2729 = vset.pattern.permute.xlu1 (!%p294_p9), %v2806_v2  ;;  %v541_v18 = vld [vmem:[%s3822_s2 + $0x20] sm:$0xff] (!%p294_p9)  ;;  %s326_s29 = sand.u32 (!%p294_p9), 1, %s2796_s12   ;;  %s3778_s23 = scalar_lea.hbm (!%p294_p9), %s3829_s9, %s2907_s22 }
  0x13   : > { %547 = vperm.xlu0 (!%p294_p9), %2728, %v537_v3   ;;  %557 = vperm.xlu1 (!%p294_p9), %2729, %v539_v5   ;;  %s2490_s30 = sshll.u32 (!%p294_p9), %s326_s29, 3  ;;  %s2413_s24 = scalar_lea.sflag (!%p294_p9), [#allocation4], %s326_s29 }
  0x14   : > { %s328_s10 = scalar_lea.vmem (!%p294_p9), [#allocation3], %s2490_s30  ;;  %s2808_s26 = smov (!%p294_p9), [#allocation3]  }
  0x15   : > { %s2427_s8 = sshll.u32 (!%p294_p9), %s328_s10, 4  ;;  %s3780_s8 = int_to_ptr.vmem [resolvable:$true] %s2427_s8 }
  0x17   : > { %552 = vperm.xlu0 (!%p294_p9), %2728, %v538_v4  }
  0x18   : > { %s331_s25 = scalar_select %p330_p10, %s2907_s22, 511 }
  0x1a   : > { %s2492_s28 = sshll.u32 %s331_s25, 3  ;;  %s2742_s25 = scalar_lea.vmem %s3780_s8, 128 }
  0x1b   : > { %s2934_s18 = scalar_lea.vmem %s3820_s0, %s2492_s28  ;;  %567 = vperm.xlu0 %2728, %v541_v18   ;;  %p2743_p11 = scmp.ne.s32.totalorder %s3780_s8, %s2742_s25 }
  0x1c   : > { %v353_v6 = vld [vmem:[%s2934_s18 + $0x80] sm:$0xff]  ;;  %v354_v7 = vld [vmem:[%s2934_s18 + $0x88] sm:$0xff]  ;;  %v355_v17 = vld [vmem:[%s2934_s18 + $0x90] sm:$0xff] }
  0x1d   : > { %v385_v8 = vld [vmem:[%s2934_s18 + $0x180] sm:$0xff]  ;;  %v473_v9 = vpack.c.bf16 %v354_v7, %v353_v6  ;;  %v386_v10 = vld [vmem:[%s2934_s18 + $0x188] sm:$0xff]  ;;  %v356_v20 = vld [vmem:[%s2934_s18 + $0x98] sm:$0xff]  ;;  %p2744_p12 = pnand %p2743_p11, %p2897_p5 }
  0x1e   : > { %v337_v11 = vld [vmem:[%s2934_s18] sm:$0xff]  ;;  %v338_v12 = vld [vmem:[%s2934_s18 + $0x8] sm:$0xff]  ;;  %v489_v13 = vpack.c.bf16 %v386_v10, %v385_v8  ;;  %v387_v21 = vld [vmem:[%s2934_s18 + $0x190] sm:$0xff]  ;;  %v474_v24 = vpack.c.bf16 %v356_v20, %v355_v17 }
  0x1f   : > { %v465_v14 = vpack.c.bf16 %v338_v12, %v337_v11  ;;  %v369_v15 = vld [vmem:[%s2934_s18 + $0x100] sm:$0xff]  ;;  %v370_v16 = vld [vmem:[%s2934_s18 + $0x108] sm:$0xff]  ;;  %2655 = vmatprep.subr.msk.bf16.mxu0 %vm605_vm0, %v473_v9  ;;  %v388_v22 = vld [vmem:[%s2934_s18 + $0x198] sm:$0xff]  ;;  %577 = vperm.xlu0 %2728, %v543_v37   ;;  %p2745_p13 = pneg %p2744_p12 }
  0x20   : > { %v481_v19 = vpack.c.bf16 %v370_v16, %v369_v15  ;;  %2663 = vmatprep.subr.msk.bf16.mxu1 %vm605_vm0, %v489_v13  ;;  %v490_v25 = vpack.c.bf16 %v388_v22, %v387_v21  ;;  %v339_v26 = vld [vmem:[%s2934_s18 + $0x10] sm:$0xff]  ;;  %v340_v27 = vld [vmem:[%s2934_s18 + $0x18] sm:$0xff]  ;;  %v357_v33 = vld [vmem:[%s2934_s18 + $0xa0] sm:$0xff] }
  0x21   : > { %v619_v23 = vsel %vm605_vm0, %v465_v14, 0  ;;  %v371_v28 = vld [vmem:[%s2934_s18 + $0x110] sm:$0xff]  ;;  %v372_v30 = vld [vmem:[%s2934_s18 + $0x118] sm:$0xff]  ;;  %v466_v31 = vpack.c.bf16 %v340_v27, %v339_v26  ;;  %v358_v34 = vld [vmem:[%s2934_s18 + $0xa8] sm:$0xff] }
  0x22   : > { %2560 = vmatpush3.bf16.xpose.msra.mxu0 %v619_v23  ;;  %v667_v29 = vsel %vm605_vm0, %v481_v19, 0  ;;  %v482_v32 = vpack.c.bf16 %v372_v30, %v371_v28  ;;  %v389_v35 = vld [vmem:[%s2934_s18 + $0x1a0] sm:$0xff]  ;;  %v390_v36 = vld [vmem:[%s2934_s18 + $0x1a8] sm:$0xff]  ;;  %v475_v39 = vpack.c.bf16 %v358_v34, %v357_v33  ;;  %v359_v48 = vld [vmem:[%s2934_s18 + $0xb0] sm:$0xff] }
  0x23   : > { %2584 = vmatpush3.bf16.xpose.msra.mxu1 %v667_v29  ;;  %2656 = vmatprep.subr.msk.bf16.mxu0 %vm605_vm0, %v474_v24  ;;  %v622_v38 = vsel %vm605_vm0, %v466_v31, 0  ;;  %v491_v41 = vpack.c.bf16 %v390_v36, %v389_v35  ;;  %v341_v42 = vld [vmem:[%s2934_s18 + $0x20] sm:$0xff]  ;;  %v342_v43 = vld [vmem:[%s2934_s18 + $0x28] sm:$0xff]  ;;  %v360_v49 = vld [vmem:[%s2934_s18 + $0xb8] sm:$0xff] }
  0x24   : > { %2664 = vmatprep.subr.msk.bf16.mxu1 %vm605_vm0, %v490_v25  ;;  %v670_v40 = vsel %vm605_vm0, %v482_v32, 0  ;;  %v373_v44 = vld [vmem:[%s2934_s18 + $0x120] sm:$0xff]  ;;  %v374_v45 = vld [vmem:[%s2934_s18 + $0x128] sm:$0xff]  ;;  %v467_v46 = vpack.c.bf16 %v342_v43, %v341_v42  ;;  %v391_v50 = vld [vmem:[%s2934_s18 + $0x1b0] sm:$0xff]  ;;  %v476_v53 = vpack.c.bf16 %v360_v49, %v359_v48 }
  0x25   : > { %v483_v47 = vpack.c.bf16 %v374_v45, %v373_v44  ;;  %v392_v51 = vld [vmem:[%s2934_s18 + $0x1b8] sm:$0xff]  ;;  %v343_v56 = vld [vmem:[%s2934_s18 + $0x30] sm:$0xff]  ;;  %v361_v62 = vld [vmem:[%s2934_s18 + $0xc0] sm:$0xff] }
  0x26   : > { %v625_v52 = vsel %vm605_vm0, %v467_v46, 0  ;;  %v492_v55 = vpack.c.bf16 %v392_v51, %v391_v50  ;;  %v344_v57 = vld [vmem:[%s2934_s18 + $0x38] sm:$0xff]  ;;  %v375_v58 = vld [vmem:[%s2934_s18 + $0x130] sm:$0xff]  ;;  %v362_v63 = vld [vmem:[%s2934_s18 + $0xc8] sm:$0xff] }
  0x27   : > { %v673_v54 = vsel %vm605_vm0, %v483_v47, 0  ;;  %v376_v59 = vld [vmem:[%s2934_s18 + $0x138] sm:$0xff]  ;;  %v468_v60 = vpack.c.bf16 %v344_v57, %v343_v56  ;;  %v393_v0 = vld [vmem:[%s2934_s18 + $0x1c0] sm:$0xff]  ;;  %v394_v3 = vld [vmem:[%s2934_s18 + $0x1c8] sm:$0xff]  ;;  %v477_v5 = vpack.c.bf16 %v362_v63, %v361_v62 }
  0x28   : > { %v484_v61 = vpack.c.bf16 %v376_v59, %v375_v58  ;;  %v493_v7 = vpack.c.bf16 %v394_v3, %v393_v0  ;;  %v345_v8 = vld [vmem:[%s2934_s18 + $0x40] sm:$0xff]  ;;  %v346_v9 = vld [vmem:[%s2934_s18 + $0x48] sm:$0xff]  ;;  %v363_v14 = vld [vmem:[%s2934_s18 + $0xd0] sm:$0xff] }
  0x29   : > { %v628_v4 = vsel %vm605_vm0, %v468_v60, 0  ;;  %v377_v10 = vld [vmem:[%s2934_s18 + $0x140] sm:$0xff]  ;;  %v378_v11 = vld [vmem:[%s2934_s18 + $0x148] sm:$0xff]  ;;  %v469_v12 = vpack.c.bf16 %v346_v9, %v345_v8  ;;  %v364_v15 = vld [vmem:[%s2934_s18 + $0xd8] sm:$0xff] }
  0x2a   : > { %2562 = vmatpush3.bf16.xpose.msra.mxu0 %v622_v38  ;;  %v676_v6 = vsel %vm605_vm0, %v484_v61, 0  ;;  %v485_v13 = vpack.c.bf16 %v378_v11, %v377_v10  ;;  %v395_v16 = vld [vmem:[%s2934_s18 + $0x1d0] sm:$0xff]  ;;  %v396_v17 = vld [vmem:[%s2934_s18 + $0x1d8] sm:$0xff]  ;;  %v478_v19 = vpack.c.bf16 %v364_v15, %v363_v14  ;;  %v365_v28 = vld [vmem:[%s2934_s18 + $0xe0] sm:$0xff] }
  0x2b   : > { %2586 = vmatpush3.bf16.xpose.msra.mxu1 %v670_v40  ;;  %2657 = vmatprep.subr.msk.bf16.mxu0 %vm605_vm0, %v475_v39  ;;  %v631_v18 = vsel %vm605_vm0, %v469_v12, 0  ;;  %v494_v21 = vpack.c.bf16 %v396_v17, %v395_v16  ;;  %v347_v22 = vld [vmem:[%s2934_s18 + $0x50] sm:$0xff]  ;;  %v348_v23 = vld [vmem:[%s2934_s18 + $0x58] sm:$0xff]  ;;  %v366_v29 = vld [vmem:[%s2934_s18 + $0xe8] sm:$0xff] }
  0x2c   : > { %2665 = vmatprep.subr.msk.bf16.mxu1 %vm605_vm0, %v491_v41  ;;  %v679_v20 = vsel %vm605_vm0, %v485_v13, 0  ;;  %v379_v24 = vld [vmem:[%s2934_s18 + $0x150] sm:$0xff]  ;;  %v380_v25 = vld [vmem:[%s2934_s18 + $0x158] sm:$0xff]  ;;  %v470_v26 = vpack.c.bf16 %v348_v23, %v347_v22  ;;  %v397_v30 = vld [vmem:[%s2934_s18 + $0x1e0] sm:$0xff]  ;;  %v479_v33 = vpack.c.bf16 %v366_v29, %v365_v28 }
  0x2d   : > { %v486_v27 = vpack.c.bf16 %v380_v25, %v379_v24  ;;  %v398_v31 = vld [vmem:[%s2934_s18 + $0x1e8] sm:$0xff]  ;;  %v540_v34 = vld [vmem:[%s3822_s2 + $0x18] sm:$0xff]  ;;  %v349_v37 = vld [vmem:[%s2934_s18 + $0x60] sm:$0xff] }
  0x2e   : > { %v634_v32 = vsel %vm605_vm0, %v470_v26, 0  ;;  %v495_v36 = vpack.c.bf16 %v398_v31, %v397_v30  ;;  %v350_v38 = vld [vmem:[%s2934_s18 + $0x68] sm:$0xff]  ;;  %562 = vperm.xlu1 %2729, %v540_v34   ;;  %v1206_v39 = vld [vmem:[%s3824_s4] sm:$0xff]  ;;  %v1208_v43 = vld [vmem:[%s3824_s4 + $0x10] sm:$0xff] }
  0x2f   : > { %v682_v35 = vsel %vm605_vm0, %v486_v27, 0  ;;  %v381_v40 = vld [vmem:[%s2934_s18 + $0x160] sm:$0xff]  ;;  %v382_v41 = vld [vmem:[%s2934_s18 + $0x168] sm:$0xff]  ;;  %1216 = vperm.xlu0 %2728, %v1206_v39   ;;  %v471_v44 = vpack.c.bf16 %v350_v38, %v349_v37  ;;  %v367_v46 = vld [vmem:[%s2934_s18 + $0xf0] sm:$0xff] }
  0x30   : > { %v542_v42 = vld [vmem:[%s3822_s2 + $0x28] sm:$0xff]  ;;  %v487_v45 = vpack.c.bf16 %v382_v41, %v381_v40  ;;  %v368_v47 = vld [vmem:[%s2934_s18 + $0xf8] sm:$0xff]  ;;  %v399_v48 = vld [vmem:[%s2934_s18 + $0x1f0] sm:$0xff] }
  0x31   : > { %v400_v49 = vld [vmem:[%s2934_s18 + $0x1f8] sm:$0xff]  ;;  %v1210_v51 = vld [vmem:[%s3824_s4 + $0x20] sm:$0xff]  ;;  %v383_v56 = vld [vmem:[%s2934_s18 + $0x170] sm:$0xff] }
  0x32   : > { %2564 = vmatpush3.bf16.xpose.msra.mxu0 %v625_v52  ;;  %572 = vperm.xlu1 %2729, %v542_v42   ;;  %v544_v50 = vld [vmem:[%s3822_s2 + $0x38] sm:$0xff]  ;;  %v637_v52 = vsel %vm605_vm0, %v471_v44, 0  ;;  %v685_v57 = vsel %vm605_vm0, %v487_v45, 0  ;;  %v496_v58 = vpack.c.bf16 %v400_v49, %v399_v48  ;;  %v1207_v60 = vld [vmem:[%s3824_s4 + $0x8] sm:$0xff]  ;;  %v1212_v61 = vld [vmem:[%s3824_s4 + $0x30] sm:$0xff] }
  0x33   : > { %2588 = vmatpush3.bf16.xpose.msra.mxu1 %v673_v54  ;;  %2658 = vmatprep.subr.msk.bf16.mxu0 %vm605_vm0, %v476_v53  ;;  %v480_v53 = vpack.c.bf16 %v368_v47, %v367_v46  ;;  %v351_v54 = vld [vmem:[%s2934_s18 + $0x70] sm:$0xff]  ;;  %v384_v59 = vld [vmem:[%s2934_s18 + $0x178] sm:$0xff]  ;;  %v417_v62 = vld [vmem:[%s2934_s18 + $0x280] sm:$0xff] }
  0x34   : > { %2666 = vmatprep.subr.msk.bf16.mxu1 %vm605_vm0, %v492_v55  ;;  %1226 = vperm.xlu0 %2728, %v1208_v43   ;;  %v352_v55 = vld [vmem:[%s2934_s18 + $0x78] sm:$0xff]  ;;  %v418_v63 = vld [vmem:[%s2934_s18 + $0x288] sm:$0xff]  ;;  %v449_v3 = vld [vmem:[%s2934_s18 + $0x380] sm:$0xff] }
  0x35   : > { %v472_v0 = vpack.c.bf16 %v352_v55, %v351_v54  ;;  %v505_v9 = vpack.c.bf16 %v418_v63, %v417_v62  ;;  %v401_v12 = vld [vmem:[%s2934_s18 + $0x200] sm:$0xff]  ;;  %v402_v13 = vld [vmem:[%s2934_s18 + $0x208] sm:$0xff]  ;;  %v1685_v17 = vld [vmem:[%s3826_s6 + $0x10] sm:$0xff] }
  0x36   : > { %582 = vperm.xlu1 %2729, %v544_v50   ;;  %v433_v14 = vld [vmem:[%s2934_s18 + $0x300] sm:$0xff]  ;;  %v434_v15 = vld [vmem:[%s2934_s18 + $0x308] sm:$0xff]  ;;  %v1213_v22 = vld [vmem:[%s3824_s4 + $0x38] sm:$0xff] }
  0x37   : > { %v640_v8 = vsel %vm605_vm0, %v472_v0, 0  ;;  %v1211_v16 = vld [vmem:[%s3824_s4 + $0x28] sm:$0xff]  ;;  %v451_v23 = vld [vmem:[%s2934_s18 + $0x390] sm:$0xff]  ;;  %v452_v24 = vld [vmem:[%s2934_s18 + $0x398] sm:$0xff] }
  0x38   : > { %1236 = vperm.xlu0 %2728, %v1210_v51   ;;  %v2119_v25 = vld [vmem:[%s3827_s7] sm:$0xff]  ;;  %v3098_v27 = vld [vmem:[%s3821_s1 + $0x8] sm:$0xff]   ;;  %v403_v30 = vld [vmem:[%s2934_s18 + $0x210] sm:$0xff] }
  0x39   : > { %v404_v31 = vld [vmem:[%s2934_s18 + $0x218] sm:$0xff]  ;;  %v1687_v37 = vld [vmem:[%s3826_s6 + $0x20] sm:$0xff]  ;;  %v422_v40 = vld [vmem:[%s2934_s18 + $0x2a8] sm:$0xff] }
  0x3a   : > { %2566 = vmatpush3.bf16.xpose.msra.mxu0 %v628_v4  ;;  %v488_v4 = vpack.c.bf16 %v384_v59, %v383_v56  ;;  %1221 = vperm.xlu1 %2729, %v1207_v60   ;;  %v436_v34 = vld [vmem:[%s2934_s18 + $0x318] sm:$0xff]  ;;  %v421_v39 = vld [vmem:[%s2934_s18 + $0x2a0] sm:$0xff]  ;;  %v454_v42 = vld [vmem:[%s2934_s18 + $0x3a8] sm:$0xff] }
  0x3b   : > { %2590 = vmatpush3.bf16.xpose.msra.mxu1 %v676_v6  ;;  %2659 = vmatprep.subr.msk.bf16.mxu0 %vm605_vm0, %v477_v5  ;;  %v450_v5 = vld [vmem:[%s2934_s18 + $0x388] sm:$0xff]  ;;  %v1209_v6 = vld [vmem:[%s3824_s4 + $0x18] sm:$0xff]  ;;  %v453_v41 = vld [vmem:[%s2934_s18 + $0x3a0] sm:$0xff]  ;;  %v507_v47 = vpack.c.bf16 %v422_v40, %v421_v39 }
  0x3c   : > { %2667 = vmatprep.subr.msk.bf16.mxu1 %vm605_vm0, %v493_v7  ;;  %1246 = vperm.xlu0 %2728, %v1212_v61   ;;  %v1683_v7 = vld [vmem:[%s3826_s6] sm:$0xff]  ;;  %v688_v10 = vsel %vm605_vm0, %v488_v4, 0  ;;  %v521_v11 = vpack.c.bf16 %v450_v5, %v449_v3  ;;  %v1686_v43 = vld [vmem:[%s3826_s6 + $0x18] sm:$0xff]  ;;  %v3132_v45 = vld [vmem:[%s3821_s1 + $0x10] sm:$0xff]   ;;  %v523_v50 = vpack.c.bf16 %v454_v42, %v453_v41 }
  0x3d   : > { %v405_v48 = vld [vmem:[%s2934_s18 + $0x220] sm:$0xff]  ;;  %v406_v49 = vld [vmem:[%s2934_s18 + $0x228] sm:$0xff]  ;;  %v455_v59 = vld [vmem:[%s2934_s18 + $0x3b0] sm:$0xff] }
  0x3e   : > { %1231 = vperm.xlu1 %2729, %v1209_v6   ;;  %v437_v51 = vld [vmem:[%s2934_s18 + $0x320] sm:$0xff]  ;;  %v499_v54 = vpack.c.bf16 %v406_v49, %v405_v48  ;;  %v2120_v55 = vld [vmem:[%s3827_s7 + $0x8] sm:$0xff]  ;;  %v456_v60 = vld [vmem:[%s2934_s18 + $0x3b8] sm:$0xff] }
  0x3f   : > { %v1689_v61 = vld [vmem:[%s3826_s6 + $0x30] sm:$0xff]  ;;  %v3166_v63 = vld [vmem:[%s3821_s1 + $0x18] sm:$0xff]   ;;  %v524_v6 = vpack.c.bf16 %v456_v60, %v455_v59  ;;  %v429_v49 = vld [vmem:[%s2934_s18 + $0x2e0] sm:$0xff] }
  0x40   : > { %1693 = vperm.xlu0 %2728, %v1683_v7   ;;  %v721_v62 = vsel %vm605_vm0, %v499_v54, 0  ;;  %v407_v4 = vld [vmem:[%s2934_s18 + $0x230] sm:$0xff]  ;;  %v408_v5 = vld [vmem:[%s2934_s18 + $0x238] sm:$0xff]  ;;  %v445_v59 = vld [vmem:[%s2934_s18 + $0x360] sm:$0xff] }
  0x41   : > { %v439_v7 = vld [vmem:[%s2934_s18 + $0x330] sm:$0xff]  ;;  %v412_v42 = vld [vmem:[%s2934_s18 + $0x258] sm:$0xff]  ;;  %v446_v60 = vld [vmem:[%s2934_s18 + $0x368] sm:$0xff] }
  0x42   : > { %2568 = vmatpush3.bf16.xpose.msra.mxu0 %v631_v18  ;;  %v497_v18 = vpack.c.bf16 %v402_v13, %v401_v12  ;;  %1241 = vperm.xlu1 %2729, %v1211_v16   ;;  %v425_v13 = vld [vmem:[%s2934_s18 + $0x2c0] sm:$0xff]  ;;  %v458_v16 = vld [vmem:[%s2934_s18 + $0x3c8] sm:$0xff]  ;;  %v411_v41 = vld [vmem:[%s2934_s18 + $0x250] sm:$0xff] }
  0x43   : > { %2592 = vmatpush3.bf16.xpose.msra.mxu1 %v679_v20  ;;  %2660 = vmatprep.subr.msk.bf16.mxu0 %vm605_vm0, %v478_v19  ;;  %v513_v19 = vpack.c.bf16 %v434_v15, %v433_v14  ;;  %v419_v20 = vld [vmem:[%s2934_s18 + $0x290] sm:$0xff]  ;;  %v426_v14 = vld [vmem:[%s2934_s18 + $0x2c8] sm:$0xff]  ;;  %v457_v15 = vld [vmem:[%s2934_s18 + $0x3c0] sm:$0xff] }
  0x44   : > { %2668 = vmatprep.subr.msk.bf16.mxu1 %vm605_vm0, %v494_v21  ;;  %v420_v21 = vld [vmem:[%s2934_s18 + $0x298] sm:$0xff]  ;;  %1703 = vperm.xlu0 %2728, %v1685_v17   ;;  %v715_v26 = vsel %vm605_vm0, %v497_v18, 0 }
  0x45   : > { %v763_v28 = vsel %vm605_vm0, %v513_v19, 0  ;;  %v506_v29 = vpack.c.bf16 %v420_v21, %v419_v20  ;;  %v2122_v17 = vld [vmem:[%s3827_s7 + $0x18] sm:$0xff]  ;;  %v509_v19 = vpack.c.bf16 %v426_v14, %v425_v13  ;;  %v525_v21 = vpack.c.bf16 %v458_v16, %v457_v15 }
  0x46   : > { %1251 = vperm.xlu1 %2729, %v1213_v22   ;;  %v409_v22 = vld [vmem:[%s2934_s18 + $0x240] sm:$0xff]  ;;  %v448_v13 = vld [vmem:[%s2934_s18 + $0x378] sm:$0xff] }
  0x48   : > { %2129 = vperm.xlu0 %2728, %v2119_v25   ;;  %v442_v25 = vld [vmem:[%s2934_s18 + $0x348] sm:$0xff] }
  0x4a   : > { %2570 = vmatpush3.bf16.xpose.msra.mxu0 %v634_v32  ;;  %v522_v32 = vpack.c.bf16 %v452_v24, %v451_v23  ;;  %v410_v23 = vld [vmem:[%s2934_s18 + $0x248] sm:$0xff]  ;;  %v441_v24 = vld [vmem:[%s2934_s18 + $0x340] sm:$0xff] }
  0x4b   : > { %2594 = vmatpush3.bf16.xpose.msra.mxu1 %v682_v35  ;;  %2661 = vmatprep.subr.msk.bf16.mxu0 %vm605_vm0, %v479_v33  ;;  %v435_v33 = vld [vmem:[%s2934_s18 + $0x310] sm:$0xff]  ;;  %v1684_v35 = vld [vmem:[%s3826_s6 + $0x8] sm:$0xff] }
  0x4c   : > { %2669 = vmatprep.subr.msk.bf16.mxu1 %vm605_vm0, %v495_v36  ;;  %v498_v36 = vpack.c.bf16 %v404_v31, %v403_v30  ;;  %v514_v38 = vpack.c.bf16 %v436_v34, %v435_v33  ;;  %1698 = vperm.xlu1 %2729, %v1684_v35   ;;  %v517_v30 = vpack.c.bf16 %v442_v25, %v441_v24  ;;  %v427_v31 = vld [vmem:[%s2934_s18 + $0x2d0] sm:$0xff]  ;;  %v460_v34 = vld [vmem:[%s2934_s18 + $0x3d8] sm:$0xff]  ;;  %v2335_v35 = vld [vmem:[#allocation2] sm:$0x1] }
  0x4d   : > { %1713 = vperm.xlu0 %2728, %v1687_v37   ;;  %v459_v33 = vld [vmem:[%s2934_s18 + $0x3d0] sm:$0xff] }
  0x4e   : > { %v718_v44 = vsel %vm605_vm0, %v498_v36, 0  ;;  %v766_v46 = vsel %vm605_vm0, %v514_v38, 0  ;;  %v2124_v38 = vld [vmem:[%s3827_s7 + $0x28] sm:$0xff]  ;;  %v775_v39 = vsel %vm605_vm0, %v517_v30, 0  ;;  %v526_v40 = vpack.c.bf16 %v460_v34, %v459_v33 }
  0x50   : > { %1708 = vperm.xlu1 %2729, %v1686_v43   ;;  %v443_v43 = vld [vmem:[%s2934_s18 + $0x350] sm:$0xff] }
  0x52   : > { %2572 = vmatpush3.bf16.xpose.msra.mxu0 %v637_v52  ;;  %v438_v52 = vld [vmem:[%s2934_s18 + $0x328] sm:$0xff] }
  0x53   : > { %2596 = vmatpush3.bf16.xpose.msra.mxu1 %v685_v57  ;;  %2662 = vmatprep.subr.msk.bf16.mxu0 %vm605_vm0, %v480_v53  ;;  %v1688_v53 = vld [vmem:[%s3826_s6 + $0x28] sm:$0xff]  ;;  %v515_v56 = vpack.c.bf16 %v438_v52, %v437_v51  ;;  %v423_v57 = vld [vmem:[%s2934_s18 + $0x2b0] sm:$0xff]  ;;  %v461_v51 = vld [vmem:[%s2934_s18 + $0x3e0] sm:$0xff] }
  0x54   : > { %2670 = vmatprep.subr.msk.bf16.mxu1 %vm605_vm0, %v496_v58  ;;  %v424_v58 = vld [vmem:[%s2934_s18 + $0x2b8] sm:$0xff]  ;;  %1718 = vperm.xlu0 %2728, %v1688_v53   ;;  %v462_v52 = vld [vmem:[%s2934_s18 + $0x3e8] sm:$0xff] }
  0x55   : > { %2134 = vperm.xlu1 %2729, %v2120_v55   ;;  %v769_v0 = vsel %vm605_vm0, %v515_v56, 0  ;;  %v508_v3 = vpack.c.bf16 %v424_v58, %v423_v57  ;;  %v527_v56 = vpack.c.bf16 %v462_v52, %v461_v51  ;;  %v413_v57 = vld [vmem:[%s2934_s18 + $0x260] sm:$0xff]  ;;  %v414_v58 = vld [vmem:[%s2934_s18 + $0x268] sm:$0xff] }
  0x58   : > { %1723 = vperm.xlu0 %2728, %v1689_v61   ;;  %v503_v61 = vpack.c.bf16 %v414_v58, %v413_v57 }
  0x5a   : > { %2574 = vmatpush3.bf16.xpose.msra.mxu0 %v640_v8  ;;  %v440_v8 = vld [vmem:[%s2934_s18 + $0x338] sm:$0xff] }
  0x5b   : > { %2598 = vmatpush3.bf16.xpose.msra.mxu1 %v688_v10  ;;  %2671 = vmatprep.subr.msk.bf16.mxu0 %vm605_vm0, %v505_v9  ;;  %v2121_v9 = vld [vmem:[%s3827_s7 + $0x10] sm:$0xff]  ;;  %v500_v10 = vpack.c.bf16 %v408_v5, %v407_v4  ;;  %v516_v12 = vpack.c.bf16 %v440_v8, %v439_v7  ;;  %v464_v5 = vld [vmem:[%s2934_s18 + $0x3f8] sm:$0xff] }
  0x5c   : > { %2679 = vmatprep.subr.msk.bf16.mxu1 %vm605_vm0, %v521_v11  ;;  %v1690_v11 = vld [vmem:[%s3826_s6 + $0x38] sm:$0xff]  ;;  %2139 = vperm.xlu1 %2729, %v2121_v9   ;;  %v463_v4 = vld [vmem:[%s2934_s18 + $0x3f0] sm:$0xff] }
  0x5d   : > { %1728 = vperm.xlu0 %2728, %v1690_v11   ;;  %v724_v18 = vsel %vm605_vm0, %v500_v10, 0  ;;  %v772_v20 = vsel %vm605_vm0, %v516_v12, 0  ;;  %v528_v9 = vpack.c.bf16 %v464_v5, %v463_v4  ;;  %v415_v10 = vld [vmem:[%s2934_s18 + $0x270] sm:$0xff]  ;;  %v416_v11 = vld [vmem:[%s2934_s18 + $0x278] sm:$0xff] }
  0x5e   : > { %v447_v12 = vld [vmem:[%s2934_s18 + $0x370] sm:$0xff]  ;;  %v504_v14 = vpack.c.bf16 %v416_v11, %v415_v10 }
  0x5f   : > { %v520_v15 = vpack.c.bf16 %v448_v13, %v447_v12 }
  0x60   : > { %2144 = vperm.xlu1 %2729, %v2122_v17   ;;  %v736_v16 = vsel %vm605_vm0, %v504_v14, 0 }
  0x61   : > { %2576 = vmatmul.mubr.msk.bf16.vlgmr.msra.gmra.mrb[0].mxu0 %vm605_vm0, %v2913_v1  ;;  %v784_v17 = vsel %vm605_vm0, %v520_v15, 0 }
  0x62   : > { %2600 = vmatmul.mubr.msk.bf16.vlgmr.msra.gmra.mrb[0].mxu1 %vm605_vm0, %v2913_v1  ;;  %2608 = vmatpush3.bf16.xpose.msra.mxu0 %v715_v26  ;;  %v2125_v26 = vld [vmem:[%s3827_s7 + $0x30] sm:$0xff] }
  0x63   : > { %2632 = vmatpush3.bf16.xpose.msra.mxu1 %v763_v28  ;;  %2577 = vmatprep.mubr.msk.bf16.mxu0 %vm605_vm0, %v3098_v27  ;;  %v501_v28 = vpack.c.bf16 %v410_v23, %v409_v22 }
  0x64   : > { %2601 = vmatprep.mubr.msk.bf16.mxu1 %vm605_vm0, %v3098_v27  ;;  %2672 = vmatprep.subr.msk.bf16.mxu0 %vm605_vm0, %v506_v29  ;;  %v2123_v29 = vld [vmem:[%s3827_s7 + $0x20] sm:$0xff] }
  0x65   : > { %2680 = vmatprep.subr.msk.bf16.mxu1 %vm605_vm0, %v522_v32  ;;  %v428_v32 = vld [vmem:[%s2934_s18 + $0x2d8] sm:$0xff]  ;;  %2159 = vperm.xlu0 %2728, %v2125_v26   ;;  %v727_v36 = vsel %vm605_vm0, %v501_v28, 0 }
  0x66   : > { %2149 = vperm.xlu1 %2729, %v2123_v29   ;;  %v510_v37 = vpack.c.bf16 %v428_v32, %v427_v31 }
  0x69   : > { %2578 = vmatmul.mubr.msk.bf16.gmra.mrb[4].mxu0 %vm605_vm0, %v3098_v27  ;;  %2338 = vperm.xlu0 %2728, %v2335_v35  }
  0x6a   : > { %2602 = vmatmul.mubr.msk.bf16.gmra.mrb[4].mxu1 %vm605_vm0, %v3098_v27  ;;  %2610 = vmatpush3.bf16.xpose.msra.mxu0 %v718_v44  ;;  %v444_v44 = vld [vmem:[%s2934_s18 + $0x358] sm:$0xff] }
  0x6b   : > { %2634 = vmatpush3.bf16.xpose.msra.mxu1 %v766_v46  ;;  %2579 = vmatprep.mubr.msk.bf16.mxu0 %vm605_vm0, %v3132_v45  ;;  %v502_v46 = vpack.c.bf16 %v412_v42, %v411_v41  ;;  %v518_v48 = vpack.c.bf16 %v444_v44, %v443_v43 }
  0x6c   : > { %2603 = vmatprep.mubr.msk.bf16.mxu1 %vm605_vm0, %v3132_v45  ;;  %2673 = vmatprep.subr.msk.bf16.mxu0 %vm605_vm0, %v507_v47  ;;  %v2126_v47 = vld [vmem:[%s3827_s7 + $0x38] sm:$0xff] }
  0x6d   : > { %2681 = vmatprep.subr.msk.bf16.mxu1 %vm605_vm0, %v523_v50  ;;  %2154 = vperm.xlu1 %2729, %v2124_v38   ;;  %v430_v50 = vld [vmem:[%s2934_s18 + $0x2e8] sm:$0xff]  ;;  %v730_v53 = vsel %vm605_vm0, %v502_v46, 0  ;;  %v778_v55 = vsel %vm605_vm0, %v518_v48, 0 }
  0x6e   : > { %v511_v54 = vpack.c.bf16 %v430_v50, %v429_v49 }
  0x71   : > { %2580 = vmatmul.mubr.msk.bf16.gmra.mrb[8].mxu0 %vm605_vm0, %v3132_v45  ;;  %2164 = vperm.xlu1 %2729, %v2126_v47  }
  0x72   : > { %2604 = vmatmul.mubr.msk.bf16.gmra.mrb[8].mxu1 %vm605_vm0, %v3132_v45  ;;  %2612 = vmatpush3.bf16.xpose.msra.mxu0 %v721_v62  ;;  %v519_v62 = vpack.c.bf16 %v446_v60, %v445_v59 }
  0x73   : > { %2636 = vmatpush3.bf16.xpose.msra.mxu1 %v769_v0  ;;  %2581 = vmatprep.mubr.msk.bf16.mxu0 %vm605_vm0, %v3166_v63  ;;  %v431_v0 = vld [vmem:[%s2934_s18 + $0x2f0] sm:$0xff] }
  0x74   : > { %2605 = vmatprep.mubr.msk.bf16.mxu1 %vm605_vm0, %v3166_v63  ;;  %2674 = vmatprep.subr.msk.bf16.mxu0 %vm605_vm0, %v508_v3  ;;  %v432_v3 = vld [vmem:[%s2934_s18 + $0x2f8] sm:$0xff]  ;;  %v781_v8 = vsel %vm605_vm0, %v519_v62, 0  ;;  %s2746_s18 = sshll.u32 %s2808_s26, 4  ;;  %s2747_s18 = int_to_ptr.vmem [resolvable:$false] %s2746_s18 }
  0x75   : > { %2682 = vmatprep.subr.msk.bf16.mxu1 %vm605_vm0, %v524_v6  ;;  %v733_v6 = vsel %vm605_vm0, %v503_v61, 0  ;;  %v512_v7 = vpack.c.bf16 %v432_v3, %v431_v0  ;;  %s2748_s27 = scalar_lea.vmem %s2747_s18, 256  ;;  %p2749_p0 = scmp.lt.s32.totalorder %s3780_s8, %s2747_s18 }
  0x76   : > { %p2750_p1 = scmp.lt.s32.totalorder %s2748_s27, %s2742_s25 }
  0x78   : > { %p2751_p2 = por %p2750_p1, %p2749_p0 }
  0x79   : > { %2582 = vmatmul.mubr.msk.bf16.gmra.mrb[12].mxu0 %vm605_vm0, %v3166_v63 }
  0x7a   : > { %2606 = vmatmul.mubr.msk.bf16.gmra.mrb[12].mxu1 %vm605_vm0, %v3166_v63  ;;  %2614 = vmatpush3.bf16.xpose.msra.mxu0 %v724_v18  ;;  %p2752_p3 = pnand %p2751_p2, %p2745_p13 }
  0x7b   : > { %2638 = vmatpush3.bf16.xpose.msra.mxu1 %v772_v20  ;;  %2675 = vmatprep.subr.msk.bf16.mxu0 %vm605_vm0, %v509_v19 }
  0x7c   : > { %2683 = vmatprep.subr.msk.bf16.mxu1 %vm605_vm0, %v525_v21  ;;  %2623 = vmatprep.mubr.msk.bf16.mxu0 %vm605_vm0, %v2913_v1 }
  0x7d   : > { %2647 = vmatprep.mubr.msk.bf16.mxu1 %vm605_vm0, %v2913_v1 }
  0x82   : > { %2616 = vmatpush3.bf16.xpose.msra.mxu0 %v727_v36 }
  0x83   : > { %2640 = vmatpush3.bf16.xpose.msra.mxu1 %v775_v39  ;;  %2676 = vmatprep.subr.msk.bf16.mxu0 %vm605_vm0, %v510_v37 }
  0x84   : > { %2684 = vmatprep.subr.msk.bf16.mxu1 %vm605_vm0, %v526_v40 }
  0x8a   : > { %2618 = vmatpush3.bf16.xpose.msra.mxu0 %v730_v53 }
  0x8b   : > { %2642 = vmatpush3.bf16.xpose.msra.mxu1 %v778_v55  ;;  %2677 = vmatprep.subr.msk.bf16.mxu0 %vm605_vm0, %v511_v54 }
  0x8c   : > { %2685 = vmatprep.subr.msk.bf16.mxu1 %vm605_vm0, %v527_v56 }
  0x92   : > { %2620 = vmatpush3.bf16.xpose.msra.mxu0 %v733_v6 }
  0x93   : > { %2644 = vmatpush3.bf16.xpose.msra.mxu1 %v781_v8  ;;  %2678 = vmatprep.subr.msk.bf16.mxu0 %vm605_vm0, %v512_v7 }
  0x94   : > { %2686 = vmatprep.subr.msk.bf16.mxu1 %vm605_vm0, %v528_v9 }
  0x9a   : > { %2622 = vmatpush3.bf16.xpose.msra.mxu0 %v736_v16 }
  0x9b   : > { %2646 = vmatpush3.bf16.xpose.msra.mxu1 %v784_v17 }
  0xa1   : > { %2624 = vmatmul.mubr.msk.bf16.vlgmr.msra.gmra.mrb[16].mxu0 %vm605_vm0, %v2913_v1 }
  0xa2   : > { %2648 = vmatmul.mubr.msk.bf16.vlgmr.msra.gmra.mrb[16].mxu1 %vm605_vm0, %v2913_v1  ;;  %2625 = vmatprep.mubr.msk.bf16.mxu0 %vm605_vm0, %v3098_v27  ;;  %v3292_v1 = vpop.permute.xlu0 %547 }
  0xa3   : > { %2649 = vmatprep.mubr.msk.bf16.mxu1 %vm605_vm0, %v3098_v27 }
  0xa9   : > { %2626 = vmatmul.mubr.msk.bf16.gmra.mrb[20].mxu0 %vm605_vm0, %v3098_v27 }
  0xaa   : > { %2650 = vmatmul.mubr.msk.bf16.gmra.mrb[20].mxu1 %vm605_vm0, %v3098_v27  ;;  %2627 = vmatprep.mubr.msk.bf16.mxu0 %vm605_vm0, %v3132_v45  ;;  %v3294_v27 = vpop.permute.xlu1 %557 }
  0xab   : > { %2651 = vmatprep.mubr.msk.bf16.mxu1 %vm605_vm0, %v3132_v45 }
  0xae   : > { %v3306_v43 = vpop.permute.xlu1 %562 }
  0xb1   : > { %2628 = vmatmul.mubr.msk.bf16.gmra.mrb[24].mxu0 %vm605_vm0, %v3132_v45 }
  0xb2   : > { %2652 = vmatmul.mubr.msk.bf16.gmra.mrb[24].mxu1 %vm605_vm0, %v3132_v45  ;;  %2629 = vmatprep.mubr.msk.bf16.mxu0 %vm605_vm0, %v3166_v63  ;;  %v3296_v45 = vpop.permute.xlu0 %552  ;;  %v3318_v13 = vpop.permute.xlu1 %572 }
  0xb3   : > { %2653 = vmatprep.mubr.msk.bf16.mxu1 %vm605_vm0, %v3166_v63 }
  0xb6   : > { %v3316_v10 = vpop.permute.xlu0 %567 }
  0xb9   : > { %2630 = vmatmul.mubr.msk.bf16.gmra.mrb[28].mxu0 %vm605_vm0, %v3166_v63 }
  0xba   : > { %2654 = vmatmul.mubr.msk.bf16.gmra.mrb[28].mxu1 %vm605_vm0, %v3166_v63  ;;  %1319 = vmatprep.mubr.bf16.mxu0 %v2806_v2 }
  0xbb   : > { %1392 = vmatprep.mubr.bf16.mxu1 %v2806_v2 }
 0x134   : > { %v844_v18 = vpop.f32.mrb[0].mxu0 }
 0x135   : > { %v845_v19 = vadd.f32 %v844_v18, %v3292_v1  ;;  %v917_v20 = vpop.f32.mrb[0].mxu1  ;;  %v846_v21 = vpop.f32.mrb[1].mxu0 }
 0x136   : > { %v918_v22 = vadd.f32 %v917_v20, %v3292_v1  ;;  %v847_v23 = vadd.f32 %v846_v21, %v3292_v1  ;;  %v919_v63 = vpop.f32.mrb[1].mxu1  ;;  %v848_v24 = vpop.f32.mrb[2].mxu0 }
 0x137   : > { %v1102_v25 = vmax.f32 %v845_v19, 0.0  ;;  %v920_v26 = vadd.f32 %v919_v63, %v3292_v1  ;;  %v849_v28 = vadd.f32 %v848_v24, %v3296_v45  ;;  %v921_v29 = vpop.f32.mrb[2].mxu1  ;;  %v850_v30 = vpop.f32.mrb[3].mxu0 }
 0x138   : > { %v1104_v31 = vmax.f32 %v918_v22, 0.0  ;;  %v922_v32 = vadd.f32 %v921_v29, %v3296_v45  ;;  %v851_v33 = vadd.f32 %v850_v30, %v3296_v45  ;;  %v923_v34 = vpop.f32.mrb[3].mxu1  ;;  %v1103_v37 = vmax.f32 %v847_v23, 0.0 }
 0x139   : > { %v1110_v35 = vmax.f32 %v849_v28, 0.0  ;;  %v924_v36 = vadd.f32 %v923_v34, %v3296_v45  ;;  %v1105_v40 = vmax.f32 %v920_v26, 0.0 }
 0x13a   : > { %v1112_v38 = vmax.f32 %v922_v32, 0.0  ;;  %v1111_v39 = vmax.f32 %v851_v33, 0.0 }
 0x13b   : > { %v1174_v41 = vpack.c.bf16 %v1110_v35, %v1102_v25  ;;  %v1113_v42 = vmax.f32 %v924_v36, 0.0 }
 0x13c   : > { %v1176_v44 = vpack.c.bf16 %v1112_v38, %v1104_v31  ;;  %v1175_v46 = vpack.c.bf16 %v1111_v39, %v1103_v37  ;;  %v854_v47 = vpop.f32.mrb[4].mxu0 }
 0x13d   : > { %v1177_v48 = vpack.c.bf16 %v1113_v42, %v1105_v40  ;;  %v855_v49 = vadd.f32 %v854_v47, %v3294_v27  ;;  %v927_v50 = vpop.f32.mrb[4].mxu1  ;;  %v856_v51 = vpop.f32.mrb[5].mxu0 }
 0x13e   : > { %1287 = vmatprep.subr.bf16.mxu0 %v1175_v46  ;;  %v928_v52 = vadd.f32 %v927_v50, %v3294_v27  ;;  %v857_v53 = vadd.f32 %v856_v51, %v3294_v27  ;;  %v929_v54 = vpop.f32.mrb[5].mxu1  ;;  %v858_v55 = vpop.f32.mrb[6].mxu0 }
 0x13f   : > { %1360 = vmatprep.subr.bf16.mxu1 %v1177_v48  ;;  %1288 = vmatpush1.bf16.msra.mxu0 %v1174_v41  ;;  %v1118_v56 = vmax.f32 %v855_v49, 0.0  ;;  %v930_v57 = vadd.f32 %v929_v54, %v3294_v27  ;;  %v859_v58 = vadd.f32 %v858_v55, %v3306_v43  ;;  %v931_v59 = vpop.f32.mrb[6].mxu1  ;;  %v860_v60 = vpop.f32.mrb[7].mxu0 }
 0x140   : > { %1361 = vmatpush1.bf16.msra.mxu1 %v1176_v44  ;;  %v1120_v61 = vmax.f32 %v928_v52, 0.0  ;;  %v1119_v62 = vmax.f32 %v857_v53, 0.0  ;;  %v932_v0 = vadd.f32 %v931_v59, %v3306_v43  ;;  %v861_v3 = vadd.f32 %v860_v60, %v3306_v43  ;;  %v933_v4 = vpop.f32.mrb[7].mxu1  ;;  %v3328_v40 = vpop.permute.xlu0 %577 }
 0x141   : > { %v1121_v5 = vmax.f32 %v930_v57, 0.0  ;;  %v1126_v6 = vmax.f32 %v859_v58, 0.0  ;;  %v934_v7 = vadd.f32 %v933_v4, %v3306_v43  ;;  %v3330_v44 = vpop.permute.xlu1 %582 }
 0x142   : > { %v1128_v8 = vmax.f32 %v932_v0, 0.0  ;;  %v1127_v9 = vmax.f32 %v861_v3, 0.0 }
 0x143   : > { %v1182_v11 = vpack.c.bf16 %v1126_v6, %v1118_v56  ;;  %v1129_v12 = vmax.f32 %v934_v7, 0.0 }
 0x144   : > { %v1184_v14 = vpack.c.bf16 %v1128_v8, %v1120_v61  ;;  %v1183_v15 = vpack.c.bf16 %v1127_v9, %v1119_v62  ;;  %v864_v16 = vpop.f32.mrb[8].mxu0 }
 0x145   : > { %v1185_v17 = vpack.c.bf16 %v1129_v12, %v1121_v5  ;;  %v865_v18 = vadd.f32 %v864_v16, %v3316_v10  ;;  %v937_v19 = vpop.f32.mrb[8].mxu1  ;;  %v866_v20 = vpop.f32.mrb[9].mxu0 }
 0x146   : > { %v938_v21 = vadd.f32 %v937_v19, %v3316_v10  ;;  %v867_v22 = vadd.f32 %v866_v20, %v3316_v10  ;;  %v939_v23 = vpop.f32.mrb[9].mxu1  ;;  %v868_v63 = vpop.f32.mrb[10].mxu0  ;;  %1289 = vmatprep.subr.bf16.mxu0 %v1183_v15  ;;  %v3354_v19 = vld [vmem:[%s3823_s3 + $0x8] sm:$0xff]   ;;  %v3365_v20 = vld [vmem:[%s3823_s3 + $0x10] sm:$0xff]  }
 0x147   : > { %v1134_v24 = vmax.f32 %v865_v18, 0.0  ;;  %v940_v25 = vadd.f32 %v939_v23, %v3316_v10  ;;  %v869_v26 = vadd.f32 %v868_v63, %v3318_v13  ;;  %v941_v28 = vpop.f32.mrb[10].mxu1  ;;  %v870_v29 = vpop.f32.mrb[11].mxu0  ;;  %1362 = vmatprep.subr.bf16.mxu1 %v1185_v17  ;;  %1290 = vmatpush1.bf16.msra.mxu0 %v1182_v11  ;;  %v3343_v18 = vld [vmem:[%s3823_s3] sm:$0xff]  }
 0x148   : > { %v1136_v30 = vmax.f32 %v938_v21, 0.0  ;;  %v1135_v31 = vmax.f32 %v867_v22, 0.0  ;;  %v942_v32 = vadd.f32 %v941_v28, %v3318_v13  ;;  %v871_v33 = vadd.f32 %v870_v29, %v3318_v13  ;;  %v943_v34 = vpop.f32.mrb[11].mxu1  ;;  %1363 = vmatpush1.bf16.msra.mxu1 %v1184_v14  ;;  %v3376_v21 = vld [vmem:[%s3823_s3 + $0x18] sm:$0xff]  }
 0x149   : > { %v1137_v35 = vmax.f32 %v940_v25, 0.0  ;;  %v1142_v36 = vmax.f32 %v869_v26, 0.0  ;;  %v944_v37 = vadd.f32 %v943_v34, %v3318_v13 }
 0x14a   : > { %v1144_v38 = vmax.f32 %v942_v32, 0.0  ;;  %v1143_v39 = vmax.f32 %v871_v33, 0.0 }
 0x14b   : > { %v1190_v41 = vpack.c.bf16 %v1142_v36, %v1134_v24  ;;  %v1145_v42 = vmax.f32 %v944_v37, 0.0 }
 0x14c   : > { %v1192_v46 = vpack.c.bf16 %v1144_v38, %v1136_v30  ;;  %v1191_v47 = vpack.c.bf16 %v1143_v39, %v1135_v31  ;;  %v874_v48 = vpop.f32.mrb[12].mxu0 }
 0x14d   : > { %v1193_v49 = vpack.c.bf16 %v1145_v42, %v1137_v35  ;;  %v875_v50 = vadd.f32 %v874_v48, %v3328_v40  ;;  %v947_v51 = vpop.f32.mrb[12].mxu1  ;;  %v876_v52 = vpop.f32.mrb[13].mxu0 }
 0x14e   : > { %v948_v53 = vadd.f32 %v947_v51, %v3328_v40  ;;  %v877_v54 = vadd.f32 %v876_v52, %v3328_v40  ;;  %v949_v55 = vpop.f32.mrb[13].mxu1  ;;  %v878_v56 = vpop.f32.mrb[14].mxu0  ;;  %1291 = vmatprep.subr.bf16.mxu0 %v1191_v47 }
 0x14f   : > { %v1150_v57 = vmax.f32 %v875_v50, 0.0  ;;  %v950_v58 = vadd.f32 %v949_v55, %v3328_v40  ;;  %v879_v59 = vadd.f32 %v878_v56, %v3330_v44  ;;  %v951_v60 = vpop.f32.mrb[14].mxu1  ;;  %v880_v61 = vpop.f32.mrb[15].mxu0  ;;  %1364 = vmatprep.subr.bf16.mxu1 %v1193_v49  ;;  %1292 = vmatpush1.bf16.msra.mxu0 %v1190_v41 }
 0x150   : > { %v1152_v62 = vmax.f32 %v948_v53, 0.0  ;;  %v1151_v0 = vmax.f32 %v877_v54, 0.0  ;;  %v952_v3 = vadd.f32 %v951_v60, %v3330_v44  ;;  %v881_v4 = vadd.f32 %v880_v61, %v3330_v44  ;;  %v953_v5 = vpop.f32.mrb[15].mxu1  ;;  %1365 = vmatpush1.bf16.msra.mxu1 %v1192_v46 }
 0x151   : > { %v1153_v6 = vmax.f32 %v950_v58, 0.0  ;;  %v1158_v7 = vmax.f32 %v879_v59, 0.0  ;;  %v954_v8 = vadd.f32 %v953_v5, %v3330_v44 }
 0x152   : > { %v1160_v9 = vmax.f32 %v952_v3, 0.0  ;;  %v1159_v11 = vmax.f32 %v881_v4, 0.0 }
 0x153   : > { %v1198_v12 = vpack.c.bf16 %v1158_v7, %v1150_v57  ;;  %v1161_v14 = vmax.f32 %v954_v8, 0.0 }
 0x154   : > { %v1200_v15 = vpack.c.bf16 %v1160_v9, %v1152_v62  ;;  %v1199_v16 = vpack.c.bf16 %v1159_v11, %v1151_v0 }
 0x155   : > { %v1201_v17 = vpack.c.bf16 %v1161_v14, %v1153_v6 }
 0x156   : > { %1293 = vmatprep.subr.bf16.mxu0 %v1199_v16 }
 0x157   : > { %1366 = vmatprep.subr.bf16.mxu1 %v1201_v17  ;;  %1294 = vmatpush1.bf16.msra.mxu0 %v1198_v12 }
 0x158   : > { %1367 = vmatpush1.bf16.msra.mxu1 %v1200_v15 }
 0x15a   : > { %2517 = vmatmul.mubr.msk.bf16.vlgmr.msra.gmra.mrb[32].mxu0 %vm1274_vm1, %v3343_v18 }
 0x15b   : > { %2521 = vmatmul.mubr.msk.bf16.vlgmr.msra.gmra.mrb[32].mxu1 %vm1274_vm1, %v3343_v18  ;;  %1329 = vmatprep.mubr.bf16.mxu0 %v2806_v2 }
 0x15c   : > { %1402 = vmatprep.mubr.bf16.mxu1 %v2806_v2 }
 0x162   : > { %2518 = vmatmul.mubr.msk.bf16.gmra.mrb[36].mxu0 %vm1274_vm1, %v3354_v19 }
 0x163   : > { %2522 = vmatmul.mubr.msk.bf16.gmra.mrb[36].mxu1 %vm1274_vm1, %v3354_v19  ;;  %1339 = vmatprep.mubr.bf16.mxu0 %v2806_v2 }
 0x164   : > { %1412 = vmatprep.mubr.bf16.mxu1 %v2806_v2 }
 0x16a   : > { %2519 = vmatmul.mubr.msk.bf16.gmra.mrb[40].mxu0 %vm1274_vm1, %v3365_v20 }
 0x16b   : > { %2523 = vmatmul.mubr.msk.bf16.gmra.mrb[40].mxu1 %vm1274_vm1, %v3365_v20  ;;  %1349 = vmatprep.mubr.bf16.mxu0 %v2806_v2 }
 0x16c   : > { %1422 = vmatprep.mubr.bf16.mxu1 %v2806_v2 }
 0x172   : > { %2520 = vmatmul.mubr.msk.bf16.gmra.mrb[44].mxu0 %vm1274_vm1, %v3376_v21 }
 0x173   : > { %2524 = vmatmul.mubr.msk.bf16.gmra.mrb[44].mxu1 %vm1274_vm1, %v3376_v21  ;;  %1465 = vmatprep.mubr.bf16.mxu0 %v2806_v2 }
 0x174   : > { %v990_v22 = vpop.f32.mrb[16].mxu0  ;;  %1538 = vmatprep.mubr.bf16.mxu1 %v2806_v2 }
 0x175   : > { %v991_v23 = vadd.f32 %v990_v22, %v3292_v1  ;;  %v1063_v63 = vpop.f32.mrb[16].mxu1  ;;  %v992_v24 = vpop.f32.mrb[17].mxu0 }
 0x176   : > { %v1064_v25 = vadd.f32 %v1063_v63, %v3292_v1  ;;  %v993_v26 = vadd.f32 %v992_v24, %v3292_v1  ;;  %v1065_v28 = vpop.f32.mrb[17].mxu1  ;;  %v994_v29 = vpop.f32.mrb[18].mxu0 }
 0x177   : > { %v1066_v30 = vadd.f32 %v1065_v28, %v3292_v1  ;;  %v995_v31 = vadd.f32 %v994_v29, %v3296_v45  ;;  %v1067_v32 = vpop.f32.mrb[18].mxu1  ;;  %v996_v33 = vpop.f32.mrb[19].mxu0  ;;  %v1106_v37 = vmax.f32 %v991_v23, 0.0 }
 0x178   : > { %v1068_v34 = vadd.f32 %v1067_v32, %v3296_v45  ;;  %v997_v35 = vadd.f32 %v996_v33, %v3296_v45  ;;  %v1069_v36 = vpop.f32.mrb[19].mxu1  ;;  %v1108_v41 = vmax.f32 %v1064_v25, 0.0  ;;  %v1107_v42 = vmax.f32 %v993_v26, 0.0 }
 0x179   : > { %v1114_v38 = vmax.f32 %v995_v31, 0.0  ;;  %v1070_v39 = vadd.f32 %v1069_v36, %v3296_v45  ;;  %v1109_v48 = vmax.f32 %v1066_v30, 0.0 }
 0x17a   : > { %v1116_v46 = vmax.f32 %v1068_v34, 0.0  ;;  %v1115_v47 = vmax.f32 %v997_v35, 0.0 }
 0x17b   : > { %v1178_v49 = vpack.c.bf16 %v1114_v38, %v1106_v37  ;;  %v1117_v1 = vmax.f32 %v1070_v39, 0.0 }
 0x17c   : > { %v1180_v50 = vpack.c.bf16 %v1116_v46, %v1108_v41  ;;  %v1179_v51 = vpack.c.bf16 %v1115_v47, %v1107_v42  ;;  %v1000_v52 = vpop.f32.mrb[20].mxu0 }
 0x17d   : > { %v1181_v53 = vpack.c.bf16 %v1117_v1, %v1109_v48  ;;  %v1001_v54 = vadd.f32 %v1000_v52, %v3294_v27  ;;  %v1073_v55 = vpop.f32.mrb[20].mxu1  ;;  %v1002_v56 = vpop.f32.mrb[21].mxu0 }
 0x17e   : > { %v1074_v57 = vadd.f32 %v1073_v55, %v3294_v27  ;;  %v1003_v58 = vadd.f32 %v1002_v56, %v3294_v27  ;;  %v1075_v45 = vpop.f32.mrb[21].mxu1  ;;  %v1004_v59 = vpop.f32.mrb[22].mxu0  ;;  %1433 = vmatprep.subr.bf16.mxu0 %v1179_v51 }
 0x17f   : > { %v1076_v60 = vadd.f32 %v1075_v45, %v3294_v27  ;;  %v1005_v61 = vadd.f32 %v1004_v59, %v3306_v43  ;;  %v1077_v62 = vpop.f32.mrb[22].mxu1  ;;  %1506 = vmatprep.subr.bf16.mxu1 %v1181_v53  ;;  %v1006_v0 = vpop.f32.mrb[23].mxu0  ;;  %1434 = vmatpush1.bf16.msra.mxu0 %v1178_v49  ;;  %v1122_v6 = vmax.f32 %v1001_v54, 0.0 }
 0x180   : > { %v1078_v3 = vadd.f32 %v1077_v62, %v3306_v43  ;;  %v1007_v4 = vadd.f32 %v1006_v0, %v3306_v43  ;;  %v1079_v5 = vpop.f32.mrb[23].mxu1  ;;  %1507 = vmatpush1.bf16.msra.mxu1 %v1180_v50  ;;  %v1124_v9 = vmax.f32 %v1074_v57, 0.0  ;;  %v1123_v11 = vmax.f32 %v1003_v58, 0.0 }
 0x181   : > { %v1130_v7 = vmax.f32 %v1005_v61, 0.0  ;;  %v1080_v8 = vadd.f32 %v1079_v5, %v3306_v43  ;;  %v1125_v14 = vmax.f32 %v1076_v60, 0.0 }
 0x182   : > { %v1132_v12 = vmax.f32 %v1078_v3, 0.0  ;;  %v1131_v27 = vmax.f32 %v1007_v4, 0.0 }
 0x183   : > { %v1186_v15 = vpack.c.bf16 %v1130_v7, %v1122_v6  ;;  %v1133_v16 = vmax.f32 %v1080_v8, 0.0 }
 0x184   : > { %v1188_v17 = vpack.c.bf16 %v1132_v12, %v1124_v9  ;;  %v1187_v22 = vpack.c.bf16 %v1131_v27, %v1123_v11  ;;  %v1010_v23 = vpop.f32.mrb[24].mxu0 }
 0x185   : > { %v1189_v63 = vpack.c.bf16 %v1133_v16, %v1125_v14  ;;  %v1011_v24 = vadd.f32 %v1010_v23, %v3316_v10  ;;  %v1083_v25 = vpop.f32.mrb[24].mxu1  ;;  %v1012_v26 = vpop.f32.mrb[25].mxu0 }
 0x186   : > { %v1084_v28 = vadd.f32 %v1083_v25, %v3316_v10  ;;  %v1013_v29 = vadd.f32 %v1012_v26, %v3316_v10  ;;  %v1085_v43 = vpop.f32.mrb[25].mxu1  ;;  %v1014_v30 = vpop.f32.mrb[26].mxu0  ;;  %1435 = vmatprep.subr.bf16.mxu0 %v1187_v22 }
 0x187   : > { %v1086_v31 = vadd.f32 %v1085_v43, %v3316_v10  ;;  %v1015_v32 = vadd.f32 %v1014_v30, %v3318_v13  ;;  %v1087_v33 = vpop.f32.mrb[26].mxu1  ;;  %1508 = vmatprep.subr.bf16.mxu1 %v1189_v63  ;;  %v1016_v34 = vpop.f32.mrb[27].mxu0  ;;  %1436 = vmatpush1.bf16.msra.mxu0 %v1186_v15  ;;  %v1138_v38 = vmax.f32 %v1011_v24, 0.0 }
 0x188   : > { %v1088_v35 = vadd.f32 %v1087_v33, %v3318_v13  ;;  %v1017_v36 = vadd.f32 %v1016_v34, %v3318_v13  ;;  %v1089_v37 = vpop.f32.mrb[27].mxu1  ;;  %1509 = vmatpush1.bf16.msra.mxu1 %v1188_v17  ;;  %v1140_v42 = vmax.f32 %v1084_v28, 0.0  ;;  %v1139_v46 = vmax.f32 %v1013_v29, 0.0 }
 0x189   : > { %v1146_v39 = vmax.f32 %v1015_v32, 0.0  ;;  %v1090_v41 = vadd.f32 %v1089_v37, %v3318_v13  ;;  %v1141_v48 = vmax.f32 %v1086_v31, 0.0 }
 0x18a   : > { %v1148_v47 = vmax.f32 %v1088_v35, 0.0  ;;  %v1147_v10 = vmax.f32 %v1017_v36, 0.0 }
 0x18b   : > { %v1194_v49 = vpack.c.bf16 %v1146_v39, %v1138_v38  ;;  %v1149_v1 = vmax.f32 %v1090_v41, 0.0 }
 0x18c   : > { %v1196_v50 = vpack.c.bf16 %v1148_v47, %v1140_v42  ;;  %v1195_v51 = vpack.c.bf16 %v1147_v10, %v1139_v46  ;;  %v1020_v52 = vpop.f32.mrb[28].mxu0 }
 0x18d   : > { %v1197_v53 = vpack.c.bf16 %v1149_v1, %v1141_v48  ;;  %v1021_v54 = vadd.f32 %v1020_v52, %v3328_v40  ;;  %v1093_v55 = vpop.f32.mrb[28].mxu1  ;;  %v1022_v56 = vpop.f32.mrb[29].mxu0 }
 0x18e   : > { %v1094_v57 = vadd.f32 %v1093_v55, %v3328_v40  ;;  %v1023_v58 = vadd.f32 %v1022_v56, %v3328_v40  ;;  %v1095_v13 = vpop.f32.mrb[29].mxu1  ;;  %v1024_v45 = vpop.f32.mrb[30].mxu0  ;;  %1437 = vmatprep.subr.bf16.mxu0 %v1195_v51 }
 0x18f   : > { %v1096_v59 = vadd.f32 %v1095_v13, %v3328_v40  ;;  %v1025_v60 = vadd.f32 %v1024_v45, %v3330_v44  ;;  %v1097_v61 = vpop.f32.mrb[30].mxu1  ;;  %1510 = vmatprep.subr.bf16.mxu1 %v1197_v53  ;;  %v1026_v62 = vpop.f32.mrb[31].mxu0  ;;  %1438 = vmatpush1.bf16.msra.mxu0 %v1194_v49  ;;  %v1154_v5 = vmax.f32 %v1021_v54, 0.0 }
 0x190   : > { %v1098_v0 = vadd.f32 %v1097_v61, %v3330_v44  ;;  %v1027_v3 = vadd.f32 %v1026_v62, %v3330_v44  ;;  %v1099_v4 = vpop.f32.mrb[31].mxu1  ;;  %1511 = vmatpush1.bf16.msra.mxu1 %v1196_v50  ;;  %v1156_v8 = vmax.f32 %v1094_v57, 0.0  ;;  %v1155_v9 = vmax.f32 %v1023_v58, 0.0 }
 0x191   : > { %v1162_v6 = vmax.f32 %v1025_v60, 0.0  ;;  %v1100_v7 = vadd.f32 %v1099_v4, %v3330_v44  ;;  %v1157_v12 = vmax.f32 %v1096_v59, 0.0  ;;  %v3440_v44 = vpop.permute.xlu0 %1216 }
 0x192   : > { %v1164_v11 = vmax.f32 %v1098_v0, 0.0  ;;  %v1163_v40 = vmax.f32 %v1027_v3, 0.0 }
 0x193   : > { %v1202_v27 = vpack.c.bf16 %v1162_v6, %v1154_v5  ;;  %v1165_v14 = vmax.f32 %v1100_v7, 0.0 }
 0x194   : > { %v1204_v15 = vpack.c.bf16 %v1164_v11, %v1156_v8  ;;  %v1203_v16 = vpack.c.bf16 %v1163_v40, %v1155_v9 }
 0x195   : > { %v1205_v17 = vpack.c.bf16 %v1165_v14, %v1157_v12  ;;  %v3452_v41 = vpop.permute.xlu0 %1226 }
 0x196   : > { %1439 = vmatprep.subr.bf16.mxu0 %v1203_v16 }
 0x197   : > { %1512 = vmatprep.subr.bf16.mxu1 %v1205_v17  ;;  %1440 = vmatpush1.bf16.msra.mxu0 %v1202_v27 }
 0x198   : > { %1513 = vmatpush1.bf16.msra.mxu1 %v1204_v15 }
 0x199   : > { %v3464_v9 = vpop.permute.xlu0 %1236 }
 0x19a   : > { %2525 = vmatmul.mubr.msk.bf16.vlgmr.msra.gmra.mrb[48].mxu0 %vm1274_vm1, %v3343_v18 }
 0x19b   : > { %2529 = vmatmul.mubr.msk.bf16.vlgmr.msra.gmra.mrb[48].mxu1 %vm1274_vm1, %v3343_v18  ;;  %1475 = vmatprep.mubr.bf16.mxu0 %v2806_v2  ;;  %v3442_v18 = vpop.permute.xlu1 %1221 }
 0x19c   : > { %1548 = vmatprep.mubr.bf16.mxu1 %v2806_v2 }
 0x19f   : > { %v3454_v10 = vpop.permute.xlu1 %1231 }
 0x1a2   : > { %2526 = vmatmul.mubr.msk.bf16.gmra.mrb[52].mxu0 %vm1274_vm1, %v3354_v19 }
 0x1a3   : > { %2530 = vmatmul.mubr.msk.bf16.gmra.mrb[52].mxu1 %vm1274_vm1, %v3354_v19  ;;  %1485 = vmatprep.mubr.bf16.mxu0 %v2806_v2  ;;  %v3466_v27 = vpop.permute.xlu1 %1241 }
 0x1a4   : > { %1558 = vmatprep.mubr.bf16.mxu1 %v2806_v2 }
 0x1aa   : > { %2527 = vmatmul.mubr.msk.bf16.gmra.mrb[56].mxu0 %vm1274_vm1, %v3365_v20 }
 0x1ab   : > { %2531 = vmatmul.mubr.msk.bf16.gmra.mrb[56].mxu1 %vm1274_vm1, %v3365_v20  ;;  %1495 = vmatprep.mubr.bf16.mxu0 %v2806_v2 }
 0x1ac   : > { %1568 = vmatprep.mubr.bf16.mxu1 %v2806_v2 }
 0x1b2   : > { %2528 = vmatmul.mubr.msk.bf16.gmra.mrb[60].mxu0 %vm1274_vm1, %v3376_v21 }
 0x1b3   : > { %2532 = vmatmul.mubr.msk.bf16.gmra.mrb[60].mxu1 %vm1274_vm1, %v3376_v21  ;;  %1795 = vmatprep.mubr.bf16.mxu0 %v2806_v2 }
 0x1b4   : > { %1868 = vmatprep.mubr.bf16.mxu1 %v2806_v2 }
 0x22d   : > { %v1321_v19 = vpop.f32.mrb[32].mxu0 }
 0x22e   : > { %v1322_v20 = vadd.f32 %v1321_v19, %v3440_v44  ;;  %v1394_v22 = vpop.f32.mrb[32].mxu1  ;;  %v1323_v23 = vpop.f32.mrb[33].mxu0 }
 0x22f   : > { %v1395_v63 = vadd.f32 %v1394_v22, %v3440_v44  ;;  %v1324_v24 = vadd.f32 %v1323_v23, %v3440_v44  ;;  %v1396_v25 = vpop.f32.mrb[33].mxu1  ;;  %v1325_v26 = vpop.f32.mrb[34].mxu0 }
 0x230   : > { %v1397_v21 = vadd.f32 %v1396_v25, %v3440_v44  ;;  %v1326_v28 = vadd.f32 %v1325_v26, %v3442_v18  ;;  %v1398_v29 = vpop.f32.mrb[34].mxu1  ;;  %v1327_v43 = vpop.f32.mrb[35].mxu0  ;;  %v1579_v33 = vmax.f32 %v1322_v20, 0.0 }
 0x231   : > { %v1399_v30 = vadd.f32 %v1398_v29, %v3442_v18  ;;  %v1328_v31 = vadd.f32 %v1327_v43, %v3442_v18  ;;  %v1400_v32 = vpop.f32.mrb[35].mxu1  ;;  %v1581_v36 = vmax.f32 %v1395_v63, 0.0  ;;  %v1580_v37 = vmax.f32 %v1324_v24, 0.0 }
 0x232   : > { %v1587_v34 = vmax.f32 %v1326_v28, 0.0  ;;  %v1401_v35 = vadd.f32 %v1400_v32, %v3442_v18  ;;  %v1582_v42 = vmax.f32 %v1397_v21, 0.0 }
 0x233   : > { %v1589_v38 = vmax.f32 %v1399_v30, 0.0  ;;  %v1588_v39 = vmax.f32 %v1328_v31, 0.0 }
 0x234   : > { %v1651_v46 = vpack.c.bf16 %v1587_v34, %v1579_v33  ;;  %v1590_v47 = vmax.f32 %v1401_v35, 0.0 }
 0x235   : > { %v1653_v48 = vpack.c.bf16 %v1589_v38, %v1581_v36  ;;  %v1652_v49 = vpack.c.bf16 %v1588_v39, %v1580_v37  ;;  %v1331_v1 = vpop.f32.mrb[36].mxu0  ;;  %v3476_v39 = vpop.permute.xlu0 %1246 }
 0x236   : > { %v1654_v50 = vpack.c.bf16 %v1590_v47, %v1582_v42  ;;  %v1332_v51 = vadd.f32 %v1331_v1, %v3452_v41  ;;  %v1404_v52 = vpop.f32.mrb[36].mxu1  ;;  %v1333_v53 = vpop.f32.mrb[37].mxu0 }
 0x237   : > { %v1405_v54 = vadd.f32 %v1404_v52, %v3452_v41  ;;  %v1334_v55 = vadd.f32 %v1333_v53, %v3452_v41  ;;  %v1406_v56 = vpop.f32.mrb[37].mxu1  ;;  %v1335_v57 = vpop.f32.mrb[38].mxu0  ;;  %1763 = vmatprep.subr.bf16.mxu0 %v1652_v49 }
 0x238   : > { %v1407_v58 = vadd.f32 %v1406_v56, %v3452_v41  ;;  %v1336_v13 = vadd.f32 %v1335_v57, %v3454_v10  ;;  %v1408_v45 = vpop.f32.mrb[38].mxu1  ;;  %1836 = vmatprep.subr.bf16.mxu1 %v1654_v50  ;;  %v1337_v59 = vpop.f32.mrb[39].mxu0  ;;  %1764 = vmatpush1.bf16.msra.mxu0 %v1651_v46  ;;  %v1595_v0 = vmax.f32 %v1332_v51, 0.0 }
 0x239   : > { %v1409_v60 = vadd.f32 %v1408_v45, %v3454_v10  ;;  %v1338_v61 = vadd.f32 %v1337_v59, %v3454_v10  ;;  %v1410_v62 = vpop.f32.mrb[39].mxu1  ;;  %1837 = vmatpush1.bf16.msra.mxu1 %v1653_v48  ;;  %v1597_v5 = vmax.f32 %v1405_v54, 0.0  ;;  %v1596_v6 = vmax.f32 %v1334_v55, 0.0  ;;  %v3478_v48 = vpop.permute.xlu1 %1251 }
 0x23a   : > { %v1603_v3 = vmax.f32 %v1336_v13, 0.0  ;;  %v1411_v4 = vadd.f32 %v1410_v62, %v3454_v10  ;;  %v1598_v11 = vmax.f32 %v1407_v58, 0.0 }
 0x23b   : > { %v1605_v7 = vmax.f32 %v1409_v60, 0.0  ;;  %v1604_v8 = vmax.f32 %v1338_v61, 0.0 }
 0x23c   : > { %v1659_v40 = vpack.c.bf16 %v1603_v3, %v1595_v0  ;;  %v1606_v12 = vmax.f32 %v1411_v4, 0.0 }
 0x23d   : > { %v1661_v14 = vpack.c.bf16 %v1605_v7, %v1597_v5  ;;  %v1660_v15 = vpack.c.bf16 %v1604_v8, %v1596_v6  ;;  %v1341_v16 = vpop.f32.mrb[40].mxu0 }
 0x23e   : > { %v1662_v17 = vpack.c.bf16 %v1606_v12, %v1598_v11  ;;  %v1342_v19 = vadd.f32 %v1341_v16, %v3464_v9  ;;  %v1414_v20 = vpop.f32.mrb[40].mxu1  ;;  %v1343_v22 = vpop.f32.mrb[41].mxu0 }
 0x23f   : > { %v1415_v23 = vadd.f32 %v1414_v20, %v3464_v9  ;;  %v1344_v63 = vadd.f32 %v1343_v22, %v3464_v9  ;;  %v1416_v24 = vpop.f32.mrb[41].mxu1  ;;  %v1345_v25 = vpop.f32.mrb[42].mxu0  ;;  %1765 = vmatprep.subr.bf16.mxu0 %v1660_v15  ;;  %v3502_v20 = vld [vmem:[%s3825_s5 + $0x8] sm:$0xff]   ;;  %v3513_v22 = vld [vmem:[%s3825_s5 + $0x10] sm:$0xff]  }
 0x240   : > { %v1417_v26 = vadd.f32 %v1416_v24, %v3464_v9  ;;  %v1346_v21 = vadd.f32 %v1345_v25, %v3466_v27  ;;  %v1418_v28 = vpop.f32.mrb[42].mxu1  ;;  %1838 = vmatprep.subr.bf16.mxu1 %v1662_v17  ;;  %v1347_v29 = vpop.f32.mrb[43].mxu0  ;;  %1766 = vmatpush1.bf16.msra.mxu0 %v1659_v40  ;;  %v1611_v32 = vmax.f32 %v1342_v19, 0.0  ;;  %v3491_v19 = vld [vmem:[%s3825_s5] sm:$0xff]  }
 0x241   : > { %v1419_v43 = vadd.f32 %v1418_v28, %v3466_v27  ;;  %v1348_v30 = vadd.f32 %v1347_v29, %v3466_v27  ;;  %v1420_v31 = vpop.f32.mrb[43].mxu1  ;;  %1839 = vmatpush1.bf16.msra.mxu1 %v1661_v14  ;;  %v1613_v35 = vmax.f32 %v1415_v23, 0.0  ;;  %v1612_v36 = vmax.f32 %v1344_v63, 0.0  ;;  %v3524_v23 = vld [vmem:[%s3825_s5 + $0x18] sm:$0xff]  }
 0x242   : > { %v1619_v33 = vmax.f32 %v1346_v21, 0.0  ;;  %v1421_v34 = vadd.f32 %v1420_v31, %v3466_v27  ;;  %v1614_v42 = vmax.f32 %v1417_v26, 0.0 }
 0x243   : > { %v1621_v37 = vmax.f32 %v1419_v43, 0.0  ;;  %v1620_v38 = vmax.f32 %v1348_v30, 0.0 }
 0x244   : > { %v1667_v46 = vpack.c.bf16 %v1619_v33, %v1611_v32  ;;  %v1622_v47 = vmax.f32 %v1421_v34, 0.0 }
 0x245   : > { %v1669_v49 = vpack.c.bf16 %v1621_v37, %v1613_v35  ;;  %v1668_v1 = vpack.c.bf16 %v1620_v38, %v1612_v36  ;;  %v1351_v50 = vpop.f32.mrb[44].mxu0 }
 0x246   : > { %v1670_v51 = vpack.c.bf16 %v1622_v47, %v1614_v42  ;;  %v1352_v52 = vadd.f32 %v1351_v50, %v3476_v39  ;;  %v1424_v53 = vpop.f32.mrb[44].mxu1  ;;  %v1353_v54 = vpop.f32.mrb[45].mxu0 }
 0x247   : > { %v1425_v55 = vadd.f32 %v1424_v53, %v3476_v39  ;;  %v1354_v56 = vadd.f32 %v1353_v54, %v3476_v39  ;;  %v1426_v57 = vpop.f32.mrb[45].mxu1  ;;  %v1355_v58 = vpop.f32.mrb[46].mxu0  ;;  %1767 = vmatprep.subr.bf16.mxu0 %v1668_v1 }
 0x248   : > { %v1427_v13 = vadd.f32 %v1426_v57, %v3476_v39  ;;  %v1356_v45 = vadd.f32 %v1355_v58, %v3478_v48  ;;  %v1428_v59 = vpop.f32.mrb[46].mxu1  ;;  %1840 = vmatprep.subr.bf16.mxu1 %v1670_v51  ;;  %v1357_v60 = vpop.f32.mrb[47].mxu0  ;;  %1768 = vmatpush1.bf16.msra.mxu0 %v1667_v46  ;;  %v1627_v3 = vmax.f32 %v1352_v52, 0.0 }
 0x249   : > { %v1429_v61 = vadd.f32 %v1428_v59, %v3478_v48  ;;  %v1358_v62 = vadd.f32 %v1357_v60, %v3478_v48  ;;  %v1430_v0 = vpop.f32.mrb[47].mxu1  ;;  %1841 = vmatpush1.bf16.msra.mxu1 %v1669_v49  ;;  %v1629_v6 = vmax.f32 %v1425_v55, 0.0  ;;  %v1628_v7 = vmax.f32 %v1354_v56, 0.0 }
 0x24a   : > { %v1635_v4 = vmax.f32 %v1356_v45, 0.0  ;;  %v1431_v5 = vadd.f32 %v1430_v0, %v3478_v48  ;;  %v1630_v40 = vmax.f32 %v1427_v13, 0.0 }
 0x24b   : > { %v1637_v8 = vmax.f32 %v1429_v61, 0.0  ;;  %v1636_v11 = vmax.f32 %v1358_v62, 0.0 }
 0x24c   : > { %v1675_v12 = vpack.c.bf16 %v1635_v4, %v1627_v3  ;;  %v1638_v14 = vmax.f32 %v1431_v5, 0.0 }
 0x24d   : > { %v1677_v15 = vpack.c.bf16 %v1637_v8, %v1629_v6  ;;  %v1676_v16 = vpack.c.bf16 %v1636_v11, %v1628_v7 }
 0x24e   : > { %v1678_v17 = vpack.c.bf16 %v1638_v14, %v1630_v40 }
 0x24f   : > { %1769 = vmatprep.subr.bf16.mxu0 %v1676_v16 }
 0x250   : > { %1842 = vmatprep.subr.bf16.mxu1 %v1678_v17  ;;  %1770 = vmatpush1.bf16.msra.mxu0 %v1675_v12 }
 0x251   : > { %1843 = vmatpush1.bf16.msra.mxu1 %v1677_v15 }
 0x253   : > { %2537 = vmatmul.mubr.msk.bf16.vlgmr.msra.gmra.mrb[64].mxu0 %vm1274_vm1, %v3491_v19 }
 0x254   : > { %2541 = vmatmul.mubr.msk.bf16.vlgmr.msra.gmra.mrb[64].mxu1 %vm1274_vm1, %v3491_v19  ;;  %1805 = vmatprep.mubr.bf16.mxu0 %v2806_v2 }
 0x255   : > { %1878 = vmatprep.mubr.bf16.mxu1 %v2806_v2 }
 0x25b   : > { %2538 = vmatmul.mubr.msk.bf16.gmra.mrb[68].mxu0 %vm1274_vm1, %v3502_v20 }
 0x25c   : > { %2542 = vmatmul.mubr.msk.bf16.gmra.mrb[68].mxu1 %vm1274_vm1, %v3502_v20  ;;  %1815 = vmatprep.mubr.bf16.mxu0 %v2806_v2 }
 0x25d   : > { %1888 = vmatprep.mubr.bf16.mxu1 %v2806_v2 }
 0x263   : > { %2539 = vmatmul.mubr.msk.bf16.gmra.mrb[72].mxu0 %vm1274_vm1, %v3513_v22 }
 0x264   : > { %2543 = vmatmul.mubr.msk.bf16.gmra.mrb[72].mxu1 %vm1274_vm1, %v3513_v22  ;;  %1825 = vmatprep.mubr.bf16.mxu0 %v2806_v2 }
 0x265   : > { %1898 = vmatprep.mubr.bf16.mxu1 %v2806_v2 }
 0x26b   : > { %2540 = vmatmul.mubr.msk.bf16.gmra.mrb[76].mxu0 %vm1274_vm1, %v3524_v23 }
 0x26c   : > { %2544 = vmatmul.mubr.msk.bf16.gmra.mrb[76].mxu1 %vm1274_vm1, %v3524_v23  ;;  %1941 = vmatprep.mubr.bf16.mxu0 %v2806_v2 }
 0x26d   : > { %v1467_v63 = vpop.f32.mrb[48].mxu0  ;;  %2014 = vmatprep.mubr.bf16.mxu1 %v2806_v2 }
 0x26e   : > { %v1468_v24 = vadd.f32 %v1467_v63, %v3440_v44  ;;  %v1540_v25 = vpop.f32.mrb[48].mxu1  ;;  %v1469_v26 = vpop.f32.mrb[49].mxu0 }
 0x26f   : > { %v1541_v21 = vadd.f32 %v1540_v25, %v3440_v44  ;;  %v1470_v28 = vadd.f32 %v1469_v26, %v3440_v44  ;;  %v1542_v29 = vpop.f32.mrb[49].mxu1  ;;  %v1471_v43 = vpop.f32.mrb[50].mxu0 }
 0x270   : > { %v1543_v30 = vadd.f32 %v1542_v29, %v3440_v44  ;;  %v1472_v31 = vadd.f32 %v1471_v43, %v3442_v18  ;;  %v1544_v32 = vpop.f32.mrb[50].mxu1  ;;  %v1473_v33 = vpop.f32.mrb[51].mxu0  ;;  %v1583_v37 = vmax.f32 %v1468_v24, 0.0 }
 0x271   : > { %v1545_v34 = vadd.f32 %v1544_v32, %v3442_v18  ;;  %v1474_v35 = vadd.f32 %v1473_v33, %v3442_v18  ;;  %v1546_v36 = vpop.f32.mrb[51].mxu1  ;;  %v1585_v46 = vmax.f32 %v1541_v21, 0.0  ;;  %v1584_v47 = vmax.f32 %v1470_v28, 0.0 }
 0x272   : > { %v1591_v38 = vmax.f32 %v1472_v31, 0.0  ;;  %v1547_v42 = vadd.f32 %v1546_v36, %v3442_v18  ;;  %v1586_v50 = vmax.f32 %v1543_v30, 0.0 }
 0x273   : > { %v1593_v49 = vmax.f32 %v1545_v34, 0.0  ;;  %v1592_v1 = vmax.f32 %v1474_v35, 0.0 }
 0x274   : > { %v1655_v51 = vpack.c.bf16 %v1591_v38, %v1583_v37  ;;  %v1594_v44 = vmax.f32 %v1547_v42, 0.0 }
 0x275   : > { %v1657_v52 = vpack.c.bf16 %v1593_v49, %v1585_v46  ;;  %v1656_v53 = vpack.c.bf16 %v1592_v1, %v1584_v47  ;;  %v1477_v54 = vpop.f32.mrb[52].mxu0 }
 0x276   : > { %v1658_v55 = vpack.c.bf16 %v1594_v44, %v1586_v50  ;;  %v1478_v56 = vadd.f32 %v1477_v54, %v3452_v41  ;;  %v1550_v57 = vpop.f32.mrb[52].mxu1  ;;  %v1479_v58 = vpop.f32.mrb[53].mxu0 }
 0x277   : > { %v1551_v13 = vadd.f32 %v1550_v57, %v3452_v41  ;;  %v1480_v45 = vadd.f32 %v1479_v58, %v3452_v41  ;;  %v1552_v18 = vpop.f32.mrb[53].mxu1  ;;  %v1481_v59 = vpop.f32.mrb[54].mxu0  ;;  %1909 = vmatprep.subr.bf16.mxu0 %v1656_v53 }
 0x278   : > { %v1553_v60 = vadd.f32 %v1552_v18, %v3452_v41  ;;  %v1482_v61 = vadd.f32 %v1481_v59, %v3454_v10  ;;  %v1554_v62 = vpop.f32.mrb[54].mxu1  ;;  %1982 = vmatprep.subr.bf16.mxu1 %v1658_v55  ;;  %v1483_v0 = vpop.f32.mrb[55].mxu0  ;;  %1910 = vmatpush1.bf16.msra.mxu0 %v1655_v51  ;;  %v1599_v6 = vmax.f32 %v1478_v56, 0.0 }
 0x279   : > { %v1555_v3 = vadd.f32 %v1554_v62, %v3454_v10  ;;  %v1484_v4 = vadd.f32 %v1483_v0, %v3454_v10  ;;  %v1556_v5 = vpop.f32.mrb[55].mxu1  ;;  %1983 = vmatpush1.bf16.msra.mxu1 %v1657_v52  ;;  %v1601_v11 = vmax.f32 %v1551_v13, 0.0  ;;  %v1600_v40 = vmax.f32 %v1480_v45, 0.0 }
 0x27a   : > { %v1607_v7 = vmax.f32 %v1482_v61, 0.0  ;;  %v1557_v8 = vadd.f32 %v1556_v5, %v3454_v10  ;;  %v1602_v14 = vmax.f32 %v1553_v60, 0.0 }
 0x27b   : > { %v1609_v12 = vmax.f32 %v1555_v3, 0.0  ;;  %v1608_v41 = vmax.f32 %v1484_v4, 0.0 }
 0x27c   : > { %v1663_v15 = vpack.c.bf16 %v1607_v7, %v1599_v6  ;;  %v1610_v16 = vmax.f32 %v1557_v8, 0.0 }
 0x27d   : > { %v1665_v17 = vpack.c.bf16 %v1609_v12, %v1601_v11  ;;  %v1664_v63 = vpack.c.bf16 %v1608_v41, %v1600_v40  ;;  %v1487_v24 = vpop.f32.mrb[56].mxu0 }
 0x27e   : > { %v1666_v25 = vpack.c.bf16 %v1610_v16, %v1602_v14  ;;  %v1488_v26 = vadd.f32 %v1487_v24, %v3464_v9  ;;  %v1560_v21 = vpop.f32.mrb[56].mxu1  ;;  %v1489_v28 = vpop.f32.mrb[57].mxu0 }
 0x27f   : > { %v1561_v29 = vadd.f32 %v1560_v21, %v3464_v9  ;;  %v1490_v43 = vadd.f32 %v1489_v28, %v3464_v9  ;;  %v1562_v10 = vpop.f32.mrb[57].mxu1  ;;  %v1491_v30 = vpop.f32.mrb[58].mxu0  ;;  %1911 = vmatprep.subr.bf16.mxu0 %v1664_v63 }
 0x280   : > { %v1563_v31 = vadd.f32 %v1562_v10, %v3464_v9  ;;  %v1492_v32 = vadd.f32 %v1491_v30, %v3466_v27  ;;  %v1564_v33 = vpop.f32.mrb[58].mxu1  ;;  %1984 = vmatprep.subr.bf16.mxu1 %v1666_v25  ;;  %v1493_v34 = vpop.f32.mrb[59].mxu0  ;;  %1912 = vmatpush1.bf16.msra.mxu0 %v1663_v15  ;;  %v1615_v38 = vmax.f32 %v1488_v26, 0.0 }
 0x281   : > { %v1565_v35 = vadd.f32 %v1564_v33, %v3466_v27  ;;  %v1494_v36 = vadd.f32 %v1493_v34, %v3466_v27  ;;  %v1566_v37 = vpop.f32.mrb[59].mxu1  ;;  %1985 = vmatpush1.bf16.msra.mxu1 %v1665_v17  ;;  %v1617_v47 = vmax.f32 %v1561_v29, 0.0  ;;  %v1616_v49 = vmax.f32 %v1490_v43, 0.0 }
 0x282   : > { %v1623_v42 = vmax.f32 %v1492_v32, 0.0  ;;  %v1567_v46 = vadd.f32 %v1566_v37, %v3466_v27  ;;  %v1618_v50 = vmax.f32 %v1563_v31, 0.0 }
 0x283   : > { %v1625_v1 = vmax.f32 %v1565_v35, 0.0  ;;  %v1624_v9 = vmax.f32 %v1494_v36, 0.0 }
 0x284   : > { %v1671_v51 = vpack.c.bf16 %v1623_v42, %v1615_v38  ;;  %v1626_v44 = vmax.f32 %v1567_v46, 0.0 }
 0x285   : > { %v1673_v52 = vpack.c.bf16 %v1625_v1, %v1617_v47  ;;  %v1672_v53 = vpack.c.bf16 %v1624_v9, %v1616_v49  ;;  %v1497_v54 = vpop.f32.mrb[60].mxu0 }
 0x286   : > { %v1674_v55 = vpack.c.bf16 %v1626_v44, %v1618_v50  ;;  %v1498_v56 = vadd.f32 %v1497_v54, %v3476_v39  ;;  %v1570_v57 = vpop.f32.mrb[60].mxu1  ;;  %v1499_v58 = vpop.f32.mrb[61].mxu0 }
 0x287   : > { %v1571_v13 = vadd.f32 %v1570_v57, %v3476_v39  ;;  %v1500_v45 = vadd.f32 %v1499_v58, %v3476_v39  ;;  %v1572_v27 = vpop.f32.mrb[61].mxu1  ;;  %v1501_v18 = vpop.f32.mrb[62].mxu0  ;;  %1913 = vmatprep.subr.bf16.mxu0 %v1672_v53 }
 0x288   : > { %v1573_v59 = vadd.f32 %v1572_v27, %v3476_v39  ;;  %v1502_v60 = vadd.f32 %v1501_v18, %v3478_v48  ;;  %v1574_v61 = vpop.f32.mrb[62].mxu1  ;;  %1986 = vmatprep.subr.bf16.mxu1 %v1674_v55  ;;  %v1503_v62 = vpop.f32.mrb[63].mxu0  ;;  %1914 = vmatpush1.bf16.msra.mxu0 %v1671_v51  ;;  %v1631_v5 = vmax.f32 %v1498_v56, 0.0 }
 0x289   : > { %v1575_v0 = vadd.f32 %v1574_v61, %v3478_v48  ;;  %v1504_v3 = vadd.f32 %v1503_v62, %v3478_v48  ;;  %v1576_v4 = vpop.f32.mrb[63].mxu1  ;;  %1987 = vmatpush1.bf16.msra.mxu1 %v1673_v52  ;;  %v1633_v8 = vmax.f32 %v1571_v13, 0.0  ;;  %v1632_v11 = vmax.f32 %v1500_v45, 0.0 }
 0x28a   : > { %v1639_v6 = vmax.f32 %v1502_v60, 0.0  ;;  %v1577_v7 = vadd.f32 %v1576_v4, %v3478_v48  ;;  %v1634_v12 = vmax.f32 %v1573_v59, 0.0  ;;  %v3586_v48 = vpop.permute.xlu0 %1693 }
 0x28b   : > { %v1641_v40 = vmax.f32 %v1575_v0, 0.0  ;;  %v1640_v39 = vmax.f32 %v1504_v3, 0.0 }
 0x28c   : > { %v1679_v41 = vpack.c.bf16 %v1639_v6, %v1631_v5  ;;  %v1642_v14 = vmax.f32 %v1577_v7, 0.0 }
 0x28d   : > { %v1681_v15 = vpack.c.bf16 %v1641_v40, %v1633_v8  ;;  %v1680_v16 = vpack.c.bf16 %v1640_v39, %v1632_v11 }
 0x28e   : > { %v1682_v17 = vpack.c.bf16 %v1642_v14, %v1634_v12 }
 0x28f   : > { %1915 = vmatprep.subr.bf16.mxu0 %v1680_v16 }
 0x290   : > { %1988 = vmatprep.subr.bf16.mxu1 %v1682_v17  ;;  %1916 = vmatpush1.bf16.msra.mxu0 %v1679_v41 }
 0x291   : > { %1989 = vmatpush1.bf16.msra.mxu1 %v1681_v15 }
 0x293   : > { %2545 = vmatmul.mubr.msk.bf16.vlgmr.msra.gmra.mrb[80].mxu0 %vm1274_vm1, %v3491_v19 }
 0x294   : > { %2549 = vmatmul.mubr.msk.bf16.vlgmr.msra.gmra.mrb[80].mxu1 %vm1274_vm1, %v3491_v19  ;;  %1951 = vmatprep.mubr.bf16.mxu0 %v2806_v2  ;;  %v3588_v19 = vpop.permute.xlu1 %1698 }
 0x295   : > { %2024 = vmatprep.mubr.bf16.mxu1 %v2806_v2 }
 0x298   : > { %v3592_v63 = vpop.permute.xlu1 %1708 }
 0x29b   : > { %2546 = vmatmul.mubr.msk.bf16.gmra.mrb[84].mxu0 %vm1274_vm1, %v3502_v20 }
 0x29c   : > { %2550 = vmatmul.mubr.msk.bf16.gmra.mrb[84].mxu1 %vm1274_vm1, %v3502_v20  ;;  %1961 = vmatprep.mubr.bf16.mxu0 %v2806_v2  ;;  %v3590_v20 = vpop.permute.xlu0 %1703 }
 0x29d   : > { %2034 = vmatprep.mubr.bf16.mxu1 %v2806_v2 }
 0x2a0   : > { %v3594_v24 = vpop.permute.xlu0 %2129 }
 0x2a3   : > { %2547 = vmatmul.mubr.msk.bf16.gmra.mrb[88].mxu0 %vm1274_vm1, %v3513_v22 }
 0x2a4   : > { %2551 = vmatmul.mubr.msk.bf16.gmra.mrb[88].mxu1 %vm1274_vm1, %v3513_v22  ;;  %1971 = vmatprep.mubr.bf16.mxu0 %v2806_v2  ;;  %v3596_v22 = vpop.permute.xlu1 %2134  ;;  %v3598_v25 = vpop.permute.xlu0 %1713 }
 0x2a5   : > { %2044 = vmatprep.mubr.bf16.mxu1 %v2806_v2 }
 0x2a8   : > { %v3600_v2 = vpop.permute.xlu1 %2139  ;;  %v3610_v51 = vpop.permute.xlu0 %1718 }
 0x2ab   : > { %2548 = vmatmul.mubr.msk.bf16.gmra.mrb[92].mxu0 %vm1274_vm1, %v3524_v23 }
 0x2ac   : > { %2552 = vmatmul.mubr.msk.bf16.gmra.mrb[92].mxu1 %vm1274_vm1, %v3524_v23  ;;  %v3614_v54 = vpop.permute.xlu1 %2144 }
 0x326   : > { %v1797_v26 = vpop.f32.mrb[64].mxu0 }
 0x327   : > { %v1798_v21 = vadd.f32 %v1797_v26, %v3586_v48  ;;  %v1870_v23 = vpop.f32.mrb[64].mxu1  ;;  %v1799_v28 = vpop.f32.mrb[65].mxu0 }
 0x328   : > { %v1871_v29 = vadd.f32 %v1870_v23, %v3586_v48  ;;  %v1800_v43 = vadd.f32 %v1799_v28, %v3586_v48  ;;  %v1872_v10 = vpop.f32.mrb[65].mxu1  ;;  %v1801_v30 = vpop.f32.mrb[66].mxu0 }
 0x329   : > { %v2055_v31 = vmax.f32 %v1798_v21, 0.0  ;;  %v1873_v32 = vadd.f32 %v1872_v10, %v3586_v48  ;;  %v1802_v33 = vadd.f32 %v1801_v30, %v3588_v19  ;;  %v1874_v34 = vpop.f32.mrb[66].mxu1  ;;  %v1803_v35 = vpop.f32.mrb[67].mxu0 }
 0x32a   : > { %v2057_v36 = vmax.f32 %v1871_v29, 0.0  ;;  %v2056_v37 = vmax.f32 %v1800_v43, 0.0  ;;  %v1875_v38 = vadd.f32 %v1874_v34, %v3588_v19  ;;  %v1804_v42 = vadd.f32 %v1803_v35, %v3588_v19  ;;  %v1876_v46 = vpop.f32.mrb[67].mxu1 }
 0x32b   : > { %v2058_v47 = vmax.f32 %v1873_v32, 0.0  ;;  %v2063_v49 = vmax.f32 %v1802_v33, 0.0  ;;  %v1877_v1 = vadd.f32 %v1876_v46, %v3588_v19  ;;  %v2167_v44 = vmul.f32 %v3594_v24, %v2055_v31  ;;  %v3633_v31 = vpop.permute.xlu0 %1723 }
 0x32c   : > { %v2065_v9 = vmax.f32 %v1875_v38, 0.0  ;;  %v2064_v50 = vmax.f32 %v1804_v42, 0.0  ;;  %v2169_v55 = vmul.f32 %v3594_v24, %v2057_v36  ;;  %v2168_v56 = vmul.f32 %v3594_v24, %v2056_v37  ;;  %v3637_v36 = vpop.permute.xlu1 %2149 }
 0x32d   : > { %v2175_v52 = vmul.f32 %v3596_v22, %v2063_v49  ;;  %v2066_v53 = vmax.f32 %v1877_v1, 0.0  ;;  %v2170_v45 = vmul.f32 %v3594_v24, %v2058_v47 }
 0x32e   : > { %v2177_v57 = vmul.f32 %v3596_v22, %v2065_v9  ;;  %v2176_v58 = vmul.f32 %v3596_v22, %v2064_v50  ;;  %v1807_v13 = vpop.f32.mrb[68].mxu0 }
 0x32f   : > { %v2231_v27 = vadd.f32 %v2175_v52, %v2167_v44  ;;  %v2178_v18 = vmul.f32 %v3596_v22, %v2066_v53  ;;  %v1808_v59 = vadd.f32 %v1807_v13, %v3590_v20  ;;  %v1880_v60 = vpop.f32.mrb[68].mxu1  ;;  %v1809_v61 = vpop.f32.mrb[69].mxu0 }
 0x330   : > { %v2257_v62 = vadd.f32 %v2177_v57, %v2169_v55  ;;  %v2244_v0 = vadd.f32 %v2176_v58, %v2168_v56  ;;  %v1881_v3 = vadd.f32 %v1880_v60, %v3590_v20  ;;  %v1810_v4 = vadd.f32 %v1809_v61, %v3590_v20  ;;  %v1882_v5 = vpop.f32.mrb[69].mxu1  ;;  %v1811_v6 = vpop.f32.mrb[70].mxu0 }
 0x331   : > { %v2270_v7 = vadd.f32 %v2178_v18, %v2170_v45  ;;  %v2071_v8 = vmax.f32 %v1808_v59, 0.0  ;;  %v1883_v11 = vadd.f32 %v1882_v5, %v3590_v20  ;;  %v1812_v40 = vadd.f32 %v1811_v6, %v3592_v63  ;;  %v1884_v39 = vpop.f32.mrb[70].mxu1  ;;  %v1813_v12 = vpop.f32.mrb[71].mxu0 }
 0x332   : > { %v2073_v41 = vmax.f32 %v1881_v3, 0.0  ;;  %v2072_v14 = vmax.f32 %v1810_v4, 0.0  ;;  %v1885_v15 = vadd.f32 %v1884_v39, %v3592_v63  ;;  %v1814_v16 = vadd.f32 %v1813_v12, %v3592_v63  ;;  %v1886_v17 = vpop.f32.mrb[71].mxu1  ;;  %v3653_v39 = vpop.permute.xlu1 %2154 }
 0x333   : > { %v2183_v26 = vmul.f32 %v3600_v2, %v2071_v8  ;;  %v2074_v21 = vmax.f32 %v1883_v11, 0.0  ;;  %v2079_v23 = vmax.f32 %v1812_v40, 0.0  ;;  %v1887_v28 = vadd.f32 %v1886_v17, %v3592_v63  ;;  %v3651_v40 = vpop.permute.xlu0 %1728 }
 0x334   : > { %v2185_v29 = vmul.f32 %v3600_v2, %v2073_v41  ;;  %v2184_v43 = vmul.f32 %v3600_v2, %v2072_v14  ;;  %v2081_v10 = vmax.f32 %v1885_v15, 0.0  ;;  %v2080_v30 = vmax.f32 %v1814_v16, 0.0 }
 0x335   : > { %v2232_v32 = vadd.f32 %v2231_v27, %v2183_v26  ;;  %v2186_v33 = vmul.f32 %v3600_v2, %v2074_v21  ;;  %v2191_v34 = vmul.f32 %v3614_v54, %v2079_v23  ;;  %v2082_v35 = vmax.f32 %v1887_v28, 0.0 }
 0x336   : > { %v2258_v37 = vadd.f32 %v2257_v62, %v2185_v29  ;;  %v2245_v38 = vadd.f32 %v2244_v0, %v2184_v43  ;;  %v2193_v42 = vmul.f32 %v3614_v54, %v2081_v10  ;;  %v2192_v46 = vmul.f32 %v3614_v54, %v2080_v30  ;;  %v1817_v47 = vpop.f32.mrb[72].mxu0 }
 0x337   : > { %v2271_v49 = vadd.f32 %v2270_v7, %v2186_v33  ;;  %v2233_v1 = vadd.f32 %v2232_v32, %v2191_v34  ;;  %v2194_v9 = vmul.f32 %v3614_v54, %v2082_v35  ;;  %v1818_v50 = vadd.f32 %v1817_v47, %v3598_v25  ;;  %v1890_v44 = vpop.f32.mrb[72].mxu1  ;;  %v1819_v52 = vpop.f32.mrb[73].mxu0 }
 0x338   : > { %v2259_v53 = vadd.f32 %v2258_v37, %v2193_v42  ;;  %v2246_v55 = vadd.f32 %v2245_v38, %v2192_v46  ;;  %v1891_v56 = vadd.f32 %v1890_v44, %v3598_v25  ;;  %v1820_v57 = vadd.f32 %v1819_v52, %v3598_v25  ;;  %v1892_v58 = vpop.f32.mrb[73].mxu1  ;;  %v1821_v13 = vpop.f32.mrb[74].mxu0 }
 0x339   : > { %v2272_v45 = vadd.f32 %v2271_v49, %v2194_v9  ;;  %v2087_v27 = vmax.f32 %v1818_v50, 0.0  ;;  %v1893_v18 = vadd.f32 %v1892_v58, %v3598_v25  ;;  %v1822_v59 = vadd.f32 %v1821_v13, %v3610_v51  ;;  %v1894_v60 = vpop.f32.mrb[74].mxu1  ;;  %v1823_v61 = vpop.f32.mrb[75].mxu0 }
 0x33a   : > { %v2089_v62 = vmax.f32 %v1891_v56, 0.0  ;;  %v2088_v0 = vmax.f32 %v1820_v57, 0.0  ;;  %v1895_v3 = vadd.f32 %v1894_v60, %v3610_v51  ;;  %v1824_v4 = vadd.f32 %v1823_v61, %v3610_v51  ;;  %v1896_v5 = vpop.f32.mrb[75].mxu1  ;;  %v3667_v56 = vpop.permute.xlu0 %2159 }
 0x33b   : > { %v2199_v6 = vmul.f32 %v3637_v36, %v2087_v27  ;;  %v2090_v7 = vmax.f32 %v1893_v18, 0.0  ;;  %v2095_v8 = vmax.f32 %v1822_v59, 0.0  ;;  %v1897_v11 = vadd.f32 %v1896_v5, %v3610_v51 }
 0x33c   : > { %v2201_v12 = vmul.f32 %v3637_v36, %v2089_v62  ;;  %v2200_v41 = vmul.f32 %v3637_v36, %v2088_v0  ;;  %v2097_v14 = vmax.f32 %v1895_v3, 0.0  ;;  %v2096_v15 = vmax.f32 %v1824_v4, 0.0  ;;  %v3673_v62 = vpop.permute.xlu1 %2164 }
 0x33d   : > { %v2234_v16 = vadd.f32 %v2233_v1, %v2199_v6  ;;  %v2202_v17 = vmul.f32 %v3637_v36, %v2090_v7  ;;  %v2207_v26 = vmul.f32 %v3653_v39, %v2095_v8  ;;  %v2098_v21 = vmax.f32 %v1897_v11, 0.0 }
 0x33e   : > { %v2260_v23 = vadd.f32 %v2259_v53, %v2201_v12  ;;  %v2247_v28 = vadd.f32 %v2246_v55, %v2200_v41  ;;  %v2209_v29 = vmul.f32 %v3653_v39, %v2097_v14  ;;  %v2208_v43 = vmul.f32 %v3653_v39, %v2096_v15  ;;  %v1827_v10 = vpop.f32.mrb[76].mxu0 }
 0x33f   : > { %v2273_v30 = vadd.f32 %v2272_v45, %v2202_v17  ;;  %v2235_v32 = vadd.f32 %v2234_v16, %v2207_v26  ;;  %v2210_v33 = vmul.f32 %v3653_v39, %v2098_v21  ;;  %v1828_v34 = vadd.f32 %v1827_v10, %v3633_v31  ;;  %v1900_v35 = vpop.f32.mrb[76].mxu1  ;;  %v1829_v37 = vpop.f32.mrb[77].mxu0 }
 0x340   : > { %v2261_v38 = vadd.f32 %v2260_v23, %v2209_v29  ;;  %v2248_v42 = vadd.f32 %v2247_v28, %v2208_v43  ;;  %v1901_v46 = vadd.f32 %v1900_v35, %v3633_v31  ;;  %v1830_v47 = vadd.f32 %v1829_v37, %v3633_v31  ;;  %v1902_v49 = vpop.f32.mrb[77].mxu1  ;;  %v1831_v1 = vpop.f32.mrb[78].mxu0 }
 0x341   : > { %v2274_v9 = vadd.f32 %v2273_v30, %v2210_v33  ;;  %v2103_v50 = vmax.f32 %v1828_v34, 0.0  ;;  %v1903_v44 = vadd.f32 %v1902_v49, %v3633_v31  ;;  %v1832_v52 = vadd.f32 %v1831_v1, %v3651_v40  ;;  %v1904_v53 = vpop.f32.mrb[78].mxu1  ;;  %v1833_v55 = vpop.f32.mrb[79].mxu0 }
 0x342   : > { %v2105_v57 = vmax.f32 %v1901_v46, 0.0  ;;  %v2104_v58 = vmax.f32 %v1830_v47, 0.0  ;;  %v1905_v13 = vadd.f32 %v1904_v53, %v3651_v40  ;;  %v1834_v45 = vadd.f32 %v1833_v55, %v3651_v40  ;;  %v1906_v27 = vpop.f32.mrb[79].mxu1 }
 0x343   : > { %v2215_v18 = vmul.f32 %v3667_v56, %v2103_v50  ;;  %v2106_v59 = vmax.f32 %v1903_v44, 0.0  ;;  %v2111_v60 = vmax.f32 %v1832_v52, 0.0  ;;  %v1907_v61 = vadd.f32 %v1906_v27, %v3651_v40  ;;  %v2339_v52 = vpop.permute.xlu0 %2338 }
 0x344   : > { %v2217_v0 = vmul.f32 %v3667_v56, %v2105_v57  ;;  %v2216_v3 = vmul.f32 %v3667_v56, %v2104_v58  ;;  %v2113_v4 = vmax.f32 %v1905_v13, 0.0  ;;  %v2112_v5 = vmax.f32 %v1834_v45, 0.0 }
 0x345   : > { %v2236_v6 = vadd.f32 %v2235_v32, %v2215_v18  ;;  %v2218_v7 = vmul.f32 %v3667_v56, %v2106_v59  ;;  %v2223_v8 = vmul.f32 %v3673_v62, %v2111_v60  ;;  %v2114_v11 = vmax.f32 %v1907_v61, 0.0 }
 0x346   : > { %v2262_v12 = vadd.f32 %v2261_v38, %v2217_v0  ;;  %v2249_v41 = vadd.f32 %v2248_v42, %v2216_v3  ;;  %v2225_v14 = vmul.f32 %v3673_v62, %v2113_v4  ;;  %v2224_v15 = vmul.f32 %v3673_v62, %v2112_v5 }
 0x347   : > { %v2341_v16 = vlaneseq  ;;  %v2275_v17 = vadd.f32 %v2274_v9, %v2218_v7  ;;  %v2237_v26 = vadd.f32 %v2236_v6, %v2223_v8  ;;  %v2226_v21 = vmul.f32 %v3673_v62, %v2114_v11 }
 0x348   : > { %v2263_v23 = vadd.f32 %v2262_v12, %v2225_v14  ;;  %v2250_v28 = vadd.f32 %v2249_v41, %v2224_v15  ;;  %v2807_v46 = vmov 1966171168  }
 0x349   : > { %v2238_v29 = vrot.slane %v2237_v26, 4  ;;  %v2276_v43 = vadd.f32 %v2275_v17, %v2226_v21  ;;  %v2342_v32 = vshrl.u32 %v2341_v16, 7  ;;  %v2366_v47 = vunpack.c.l.s4 %v2807_v46 }
 0x34a   : > { %v2264_v10 = vrot.slane %v2263_v23, 4  ;;  %v2251_v30 = vrot.slane %v2250_v28, 4 }
 0x34b   : > { %v2239_v33 = vadd.f32 %v2238_v29, %v2237_v26  ;;  %v2277_v34 = vrot.slane %v2276_v43, 4  ;;  %v2343_v9 = vsub.s32 0, %v2342_v32  ;;  %v2367_v13 = vunpack.c.0.s8 %v2366_v47 }
 0x34c   : > { %v2265_v35 = vadd.f32 %v2264_v10, %v2263_v23  ;;  %v2252_v37 = vadd.f32 %v2251_v30, %v2250_v28 }
 0x34d   : > { %v2240_v38 = vrot.slane %v2239_v33, 2  ;;  %v2278_v42 = vadd.f32 %v2277_v34, %v2276_v43  ;;  %v3682_v18 = vrot.slane %v2339_v52, %v2343_v9  ;;  %v3685_v5 = vsub.s32 %v2367_v13, %v2342_v32 }
 0x34e   : > { %v2266_v49 = vrot.slane %v2265_v35, 2  ;;  %v2253_v1 = vrot.slane %v2252_v37, 2 }
 0x34f   : > { %v2241_v50 = vadd.f32 %v2240_v38, %v2239_v33  ;;  %v2279_v44 = vrot.slane %v2278_v42, 2 }
 0x350   : > { %v2267_v53 = vadd.f32 %v2266_v49, %v2265_v35  ;;  %v2254_v55 = vadd.f32 %v2253_v1, %v2252_v37 }
 0x351   : > { %v2242_v57 = vrot.slane %v2241_v50, 1  ;;  %v2280_v58 = vadd.f32 %v2279_v44, %v2278_v42 }
 0x352   : > { %v2268_v45 = vrot.slane %v2267_v53, 1  ;;  %v2255_v27 = vrot.slane %v2254_v55, 1 }
 0x353   : > { %v2243_v59 = vadd.f32 %v2242_v57, %v2241_v50  ;;  %v2281_v60 = vrot.slane %v2280_v58, 1 }
 0x354   : > { %v2269_v61 = vadd.f32 %v2268_v45, %v2267_v53  ;;  %v2256_v0 = vadd.f32 %v2255_v27, %v2254_v55 }
 0x355   : > { %v2345_v3 = vadd.f32 %v3682_v18, %v2243_v59  ;;  %v2282_v4 = vadd.f32 %v2281_v60, %v2280_v58 }
 0x356   : > { %v2347_v6 = vadd.f32 %v3682_v18, %v2269_v61  ;;  %v2346_v7 = vadd.f32 %v3682_v18, %v2256_v0 }
 0x357   : > { %v2348_v8 = vadd.f32 %v3682_v18, %v2282_v4 }
 0x358   : > { %v2361_v11 = vcombine.low %v2345_v3, %v2346_v7 }
 0x359   : > { %v2362_v12 = vcombine.low %v2347_v6, %v2348_v8 }
 0x35a   : > { %v3691_v41 = vrot.slane %v2361_v11, %v3685_v5 }
 0x35b   : > { %v3694_v14 = vrot.slane %v2362_v12, %v3685_v5 }
 0x35d   : > { %v2393_v15 = vcombine.low %v3691_v41, %v3694_v14 }
 0x366   : > { %v1943_v16 = vpop.f32.mrb[80].mxu0 }
 0x367   : > { %v1944_v17 = vadd.f32 %v1943_v16, %v3586_v48  ;;  %v2016_v26 = vpop.f32.mrb[80].mxu1  ;;  %v1945_v21 = vpop.f32.mrb[81].mxu0 }
 0x368   : > { %v2017_v23 = vadd.f32 %v2016_v26, %v3586_v48  ;;  %v1946_v28 = vadd.f32 %v1945_v21, %v3586_v48  ;;  %v2018_v29 = vpop.f32.mrb[81].mxu1  ;;  %v1947_v43 = vpop.f32.mrb[82].mxu0 }
 0x369   : > { %v2059_v10 = vmax.f32 %v1944_v17, 0.0  ;;  %v2019_v30 = vadd.f32 %v2018_v29, %v3586_v48  ;;  %v1948_v32 = vadd.f32 %v1947_v43, %v3588_v19  ;;  %v2020_v33 = vpop.f32.mrb[82].mxu1  ;;  %v1949_v34 = vpop.f32.mrb[83].mxu0 }
 0x36a   : > { %v2061_v35 = vmax.f32 %v2017_v23, 0.0  ;;  %v2060_v37 = vmax.f32 %v1946_v28, 0.0  ;;  %v2021_v38 = vadd.f32 %v2020_v33, %v3588_v19  ;;  %v1950_v42 = vadd.f32 %v1949_v34, %v3588_v19  ;;  %v2022_v46 = vpop.f32.mrb[83].mxu1 }
 0x36b   : > { %v2062_v47 = vmax.f32 %v2019_v30, 0.0  ;;  %v2067_v49 = vmax.f32 %v1948_v32, 0.0  ;;  %v2023_v1 = vadd.f32 %v2022_v46, %v3588_v19  ;;  %v2171_v44 = vmul.f32 %v3594_v24, %v2059_v10 }
 0x36c   : > { %v2069_v9 = vmax.f32 %v2021_v38, 0.0  ;;  %v2068_v50 = vmax.f32 %v1950_v42, 0.0  ;;  %v2173_v53 = vmul.f32 %v3594_v24, %v2061_v35  ;;  %v2172_v55 = vmul.f32 %v3594_v24, %v2060_v37 }
 0x36d   : > { %v2179_v48 = vmul.f32 %v3596_v22, %v2067_v49  ;;  %v2070_v52 = vmax.f32 %v2023_v1, 0.0  ;;  %v2174_v45 = vmul.f32 %v3594_v24, %v2062_v47 }
 0x36e   : > { %v2181_v57 = vmul.f32 %v3596_v22, %v2069_v9  ;;  %v2180_v58 = vmul.f32 %v3596_v22, %v2068_v50  ;;  %v1953_v13 = vpop.f32.mrb[84].mxu0 }
 0x36f   : > { %v2283_v27 = vadd.f32 %v2179_v48, %v2171_v44  ;;  %v2182_v19 = vmul.f32 %v3596_v22, %v2070_v52  ;;  %v1954_v59 = vadd.f32 %v1953_v13, %v3590_v20  ;;  %v2026_v60 = vpop.f32.mrb[84].mxu1  ;;  %v1955_v61 = vpop.f32.mrb[85].mxu0 }
 0x370   : > { %v2309_v0 = vadd.f32 %v2181_v57, %v2173_v53  ;;  %v2296_v3 = vadd.f32 %v2180_v58, %v2172_v55  ;;  %v2027_v4 = vadd.f32 %v2026_v60, %v3590_v20  ;;  %v1956_v6 = vadd.f32 %v1955_v61, %v3590_v20  ;;  %v2028_v7 = vpop.f32.mrb[85].mxu1  ;;  %v1957_v8 = vpop.f32.mrb[86].mxu0 }
 0x371   : > { %v2322_v11 = vadd.f32 %v2182_v19, %v2174_v45  ;;  %v2075_v12 = vmax.f32 %v1954_v59, 0.0  ;;  %v2029_v16 = vadd.f32 %v2028_v7, %v3590_v20  ;;  %v1958_v24 = vadd.f32 %v1957_v8, %v3592_v63  ;;  %v2030_v17 = vpop.f32.mrb[86].mxu1  ;;  %v1959_v22 = vpop.f32.mrb[87].mxu0 }
 0x372   : > { %v2077_v26 = vmax.f32 %v2027_v4, 0.0  ;;  %v2076_v21 = vmax.f32 %v1956_v6, 0.0  ;;  %v2031_v23 = vadd.f32 %v2030_v17, %v3592_v63  ;;  %v1960_v28 = vadd.f32 %v1959_v22, %v3592_v63  ;;  %v2032_v29 = vpop.f32.mrb[87].mxu1 }
 0x373   : > { %v2187_v43 = vmul.f32 %v3600_v2, %v2075_v12  ;;  %v2078_v10 = vmax.f32 %v2029_v16, 0.0  ;;  %v2083_v30 = vmax.f32 %v1958_v24, 0.0  ;;  %v2033_v32 = vadd.f32 %v2032_v29, %v3592_v63 }
 0x374   : > { %v2189_v33 = vmul.f32 %v3600_v2, %v2077_v26  ;;  %v2188_v20 = vmul.f32 %v3600_v2, %v2076_v21  ;;  %v2085_v34 = vmax.f32 %v2031_v23, 0.0  ;;  %v2084_v35 = vmax.f32 %v1960_v28, 0.0 }
 0x375   : > { %v2284_v37 = vadd.f32 %v2283_v27, %v2187_v43  ;;  %v2190_v38 = vmul.f32 %v3600_v2, %v2078_v10  ;;  %v2195_v42 = vmul.f32 %v3614_v54, %v2083_v30  ;;  %v2086_v46 = vmax.f32 %v2033_v32, 0.0 }
 0x376   : > { %v2310_v47 = vadd.f32 %v2309_v0, %v2189_v33  ;;  %v2297_v49 = vadd.f32 %v2296_v3, %v2188_v20  ;;  %v2197_v1 = vmul.f32 %v3614_v54, %v2085_v34  ;;  %v2196_v9 = vmul.f32 %v3614_v54, %v2084_v35  ;;  %v1963_v50 = vpop.f32.mrb[88].mxu0 }
 0x377   : > { %v2323_v63 = vadd.f32 %v2322_v11, %v2190_v38  ;;  %v2285_v44 = vadd.f32 %v2284_v37, %v2195_v42  ;;  %v2198_v48 = vmul.f32 %v3614_v54, %v2086_v46  ;;  %v1964_v52 = vadd.f32 %v1963_v50, %v3598_v25  ;;  %v2036_v53 = vpop.f32.mrb[88].mxu1  ;;  %v1965_v55 = vpop.f32.mrb[89].mxu0 }
 0x378   : > { %v2311_v57 = vadd.f32 %v2310_v47, %v2197_v1  ;;  %v2298_v2 = vadd.f32 %v2297_v49, %v2196_v9  ;;  %v2037_v58 = vadd.f32 %v2036_v53, %v3598_v25  ;;  %v1966_v13 = vadd.f32 %v1965_v55, %v3598_v25  ;;  %v2038_v45 = vpop.f32.mrb[89].mxu1  ;;  %v1967_v27 = vpop.f32.mrb[90].mxu0 }
 0x379   : > { %v2324_v19 = vadd.f32 %v2323_v63, %v2198_v48  ;;  %v2091_v59 = vmax.f32 %v1964_v52, 0.0  ;;  %v2039_v60 = vadd.f32 %v2038_v45, %v3598_v25  ;;  %v1968_v61 = vadd.f32 %v1967_v27, %v3610_v51  ;;  %v2040_v0 = vpop.f32.mrb[90].mxu1  ;;  %v1969_v54 = vpop.f32.mrb[91].mxu0 }
 0x37a   : > { %v2093_v3 = vmax.f32 %v2037_v58, 0.0  ;;  %v2092_v4 = vmax.f32 %v1966_v13, 0.0  ;;  %v2041_v6 = vadd.f32 %v2040_v0, %v3610_v51  ;;  %v1970_v7 = vadd.f32 %v1969_v54, %v3610_v51  ;;  %v2042_v8 = vpop.f32.mrb[91].mxu1 }
 0x37b   : > { %v2203_v11 = vmul.f32 %v3637_v36, %v2091_v59  ;;  %v2094_v12 = vmax.f32 %v2039_v60, 0.0  ;;  %v2099_v16 = vmax.f32 %v1968_v61, 0.0  ;;  %v2043_v24 = vadd.f32 %v2042_v8, %v3610_v51 }
 0x37c   : > { %v2205_v17 = vmul.f32 %v3637_v36, %v2093_v3  ;;  %v2204_v25 = vmul.f32 %v3637_v36, %v2092_v4  ;;  %v2101_v22 = vmax.f32 %v2041_v6, 0.0  ;;  %v2100_v26 = vmax.f32 %v1970_v7, 0.0 }
 0x37d   : > { %v2286_v21 = vadd.f32 %v2285_v44, %v2203_v11  ;;  %v2206_v23 = vmul.f32 %v3637_v36, %v2094_v12  ;;  %v2211_v28 = vmul.f32 %v3653_v39, %v2099_v16  ;;  %v2102_v29 = vmax.f32 %v2043_v24, 0.0 }
 0x37e   : > { %v2312_v43 = vadd.f32 %v2311_v57, %v2205_v17  ;;  %v2299_v10 = vadd.f32 %v2298_v2, %v2204_v25  ;;  %v2213_v30 = vmul.f32 %v3653_v39, %v2101_v22  ;;  %v2212_v32 = vmul.f32 %v3653_v39, %v2100_v26  ;;  %v1973_v33 = vpop.f32.mrb[92].mxu0 }
 0x37f   : > { %v2325_v51 = vadd.f32 %v2324_v19, %v2206_v23  ;;  %v2287_v20 = vadd.f32 %v2286_v21, %v2211_v28  ;;  %v2214_v34 = vmul.f32 %v3653_v39, %v2102_v29  ;;  %v1974_v35 = vadd.f32 %v1973_v33, %v3633_v31  ;;  %v2046_v37 = vpop.f32.mrb[92].mxu1  ;;  %v1975_v38 = vpop.f32.mrb[93].mxu0 }
 0x380   : > { %v2313_v42 = vadd.f32 %v2312_v43, %v2213_v30  ;;  %v2300_v36 = vadd.f32 %v2299_v10, %v2212_v32  ;;  %v2047_v46 = vadd.f32 %v2046_v37, %v3633_v31  ;;  %v1976_v47 = vadd.f32 %v1975_v38, %v3633_v31  ;;  %v2048_v49 = vpop.f32.mrb[93].mxu1  ;;  %v1977_v1 = vpop.f32.mrb[94].mxu0 }
 0x381   : > { %v2326_v9 = vadd.f32 %v2325_v51, %v2214_v34  ;;  %v2107_v50 = vmax.f32 %v1974_v35, 0.0  ;;  %v2049_v63 = vadd.f32 %v2048_v49, %v3633_v31  ;;  %v1978_v44 = vadd.f32 %v1977_v1, %v3651_v40  ;;  %v2050_v48 = vpop.f32.mrb[94].mxu1  ;;  %v1979_v39 = vpop.f32.mrb[95].mxu0 }
 0x382   : > { %v2109_v52 = vmax.f32 %v2047_v46, 0.0  ;;  %v2108_v53 = vmax.f32 %v1976_v47, 0.0  ;;  %v2051_v55 = vadd.f32 %v2050_v48, %v3651_v40  ;;  %v1980_v57 = vadd.f32 %v1979_v39, %v3651_v40  ;;  %v2052_v2 = vpop.f32.mrb[95].mxu1 }
 0x383   : > { %v2219_v58 = vmul.f32 %v3667_v56, %v2107_v50  ;;  %v2110_v13 = vmax.f32 %v2049_v63, 0.0  ;;  %v2115_v45 = vmax.f32 %v1978_v44, 0.0  ;;  %v2053_v27 = vadd.f32 %v2052_v2, %v3651_v40 }
 0x384   : > { %v2221_v19 = vmul.f32 %v3667_v56, %v2109_v52  ;;  %v2220_v31 = vmul.f32 %v3667_v56, %v2108_v53  ;;  %v2117_v59 = vmax.f32 %v2051_v55, 0.0  ;;  %v2116_v60 = vmax.f32 %v1980_v57, 0.0 }
 0x385   : > { %v2288_v61 = vadd.f32 %v2287_v20, %v2219_v58  ;;  %v2222_v0 = vmul.f32 %v3667_v56, %v2110_v13  ;;  %v2227_v54 = vmul.f32 %v3673_v62, %v2115_v45  ;;  %v2118_v3 = vmax.f32 %v2053_v27, 0.0 }
 0x386   : > { %v2314_v4 = vadd.f32 %v2313_v42, %v2221_v19  ;;  %v2301_v6 = vadd.f32 %v2300_v36, %v2220_v31  ;;  %v2229_v7 = vmul.f32 %v3673_v62, %v2117_v59  ;;  %v2228_v8 = vmul.f32 %v3673_v62, %v2116_v60 }
 0x387   : > { %v2327_v11 = vadd.f32 %v2326_v9, %v2222_v0  ;;  %v2289_v40 = vadd.f32 %v2288_v61, %v2227_v54  ;;  %v2230_v12 = vmul.f32 %v3673_v62, %v2118_v3  ;;  %v2401_v53 = vrot.slane %v2393_v15, %v3685_v5 }
 0x388   : > { %v2315_v16 = vadd.f32 %v2314_v4, %v2229_v7  ;;  %v2302_v24 = vadd.f32 %v2301_v6, %v2228_v8 }
 0x389   : > { %v2290_v17 = vrot.slane %v2289_v40, 4  ;;  %v2328_v25 = vadd.f32 %v2327_v11, %v2230_v12 }
 0x38a   : > { %v2316_v22 = vrot.slane %v2315_v16, 4  ;;  %v2303_v26 = vrot.slane %v2302_v24, 4 }
 0x38b   : > { %v2291_v56 = vadd.f32 %v2290_v17, %v2289_v40  ;;  %v2329_v21 = vrot.slane %v2328_v25, 4 }
 0x38c   : > { %v2317_v23 = vadd.f32 %v2316_v22, %v2315_v16  ;;  %v2304_v28 = vadd.f32 %v2303_v26, %v2302_v24 }
 0x38d   : > { %v2292_v29 = vrot.slane %v2291_v56, 2  ;;  %v2330_v43 = vadd.f32 %v2329_v21, %v2328_v25 }
 0x38e   : > { %v2318_v10 = vrot.slane %v2317_v23, 2  ;;  %v2305_v30 = vrot.slane %v2304_v28, 2 }
 0x38f   : > { %v2293_v32 = vadd.f32 %v2292_v29, %v2291_v56  ;;  %v2331_v33 = vrot.slane %v2330_v43, 2 }
 0x390   : > { %v2319_v51 = vadd.f32 %v2318_v10, %v2317_v23  ;;  %v2306_v20 = vadd.f32 %v2305_v30, %v2304_v28 }
 0x391   : > { %v2294_v62 = vrot.slane %v2293_v32, 1  ;;  %v2332_v34 = vadd.f32 %v2331_v33, %v2330_v43 }
 0x392   : > { %v2320_v35 = vrot.slane %v2319_v51, 1  ;;  %v2307_v37 = vrot.slane %v2306_v20, 1 }
 0x393   : > { %v2295_v38 = vadd.f32 %v2294_v62, %v2293_v32  ;;  %v2333_v42 = vrot.slane %v2332_v34, 1 }
 0x394   : > { %v2321_v36 = vadd.f32 %v2320_v35, %v2319_v51  ;;  %v2308_v46 = vadd.f32 %v2307_v37, %v2306_v20 }
 0x395   : > { %v2349_v47 = vadd.f32 %v3682_v18, %v2295_v38  ;;  %v2334_v49 = vadd.f32 %v2333_v42, %v2332_v34 }
 0x396   : > { %v2351_v1 = vadd.f32 %v3682_v18, %v2321_v36  ;;  %v2350_v9 = vadd.f32 %v3682_v18, %v2308_v46 }
 0x397   : > { %v2352_v50 = vadd.f32 %v3682_v18, %v2334_v49 }
 0x398   : > { %v2363_v63 = vcombine.low %v2349_v47, %v2350_v9 }
 0x399   : > { %v2364_v44 = vcombine.low %v2351_v1, %v2352_v50 }
 0x39a   : > { %v2385_v48 = vrot.slane %v2363_v63, %v3685_v5 }
 0x39b   : > { %v2392_v39 = vrot.slane %v2364_v44, %v3685_v5 }
 0x39d   : > { %v2394_v52 = vcombine.low %v2385_v48, %v2392_v39 }
 0x39f   : > { %v2408_v55 = vrot.slane %v2394_v52, %v3685_v5 }
 0x3a1   : > { %v2409_v57 = vcombine.low %v2401_v53, %v2408_v55 }
 0x3a3   : > { %2411 = vst [vmem:[%s328_s10] sm:$0xff] %v2409_v57 }
 0x3a4   : > { %2755 = shalt.err (!%p2752_p3)
}
 0x3a5   : > { %s2756_s22 = scalar_lea.hbm %s3778_s23, 128  ;;  %s2760_s30 = scalar_lea.hbm %s3829_s9, 512 }
 0x3a6   : > { %p2757_p4 = scmp.ne.s32.totalorder %s3778_s23, %s2756_s22  ;;  %p2761_p9 = scmp.lt.u32.totalorder %s3778_s23, %s3829_s9 }
 0x3a7   : > { %p2762_p10 = scmp.lt.u32.totalorder %s2760_s30, %s2756_s22  ;;  %p2764_p12 = scmp.lt.u32.totalorder %s2756_s22, %s3778_s23 }
 0x3a8   : > { %p2758_p7 = pnand %p2757_p4, %p2897_p5 }
 0x3a9   : > { %p2763_p11 = por %p2762_p10, %p2761_p9 }
 0x3aa   : > { %p2759_p8 = pneg %p2758_p7 }
 0x3ab   : > { %p2765_p13 = por %p2764_p12, %p2763_p11 }
 0x3ad   : > { %p2766_p0 = pnand %p2765_p13, %p2759_p8 }
 0x3af   : > { %2769 = shalt.err (!%p2766_p0)
}
 0x3b0   : > { %2687 = dma.vmem_to_hbm [thread:$0]  (%p2897_p5), %s3780_s8, 128, %s3778_s23, %s2413_s24  }
 0x3b1 PF: > { %p2693_p1 = scmp.ge.s32.totalorder %s2804_s14, 2  ;;  %s2439_s17 = sand.u32 1, %s2792_s11  }
 0x3b2   : > { %s2440_s25 = scalar_lea.sflag [#allocation4], %s2439_s17 }
 0x3b3   : > { %p2690_p2 = pnand %p2693_p1, %p2901_p6 }
 0x3b5   : > { %2787 = dma.done.wait (!%p2690_p2), %s2440_s25, 128  }
 0x3b6   : > { %2789 = vsyncadd (!%p2690_p2), %s2440_s25, 4294967168  ;;  %p21_p3 = scmp.ge.s32.totalorder %s2885_s16, 6   ;;  %s3832_s11 = smov %s2796_s12 }
 0x3b7   : > { %s3833_s12 = smov %s2800_s13  ;;  %s3834_s13 = smov %s2895_s19 }
 0x3b8   : > { %s3835_s14 = smov %s2885_s16  ;;  %23 = sbr.rel (!%p21_p3) target bundleno = 6 (0x6), region = 91 }
 0x3bf   :  { %2445 = vsyncpa [#allocation4], 1 }
 0x3c0   :  { %2447 = vsyncpa [#allocation4 + $0x1], 1 }

</bundles_post_ra>
